<compile_context>
chip_gen: v7x
topology: tpu7x:2x2x1
jax: 0.10.0
libtpu: 0.0.40
codegen_flags: <defaults>
</compile_context>

<pallas_src>
import functools

import numpy as np

import jax
import jax.numpy as jnp
from jax.experimental import pallas as pl
from jax.experimental.pallas import tpu as pltpu


# Conv stack hyper-parameters (fixed by the PyTorch module).
K1, S1 = 8, 4
K2, S2 = 4, 2
K3, S3 = 3, 1
C1P = 64     # packed (actor+critic) conv1 output channels: 32 + 32
C2P = 128    # packed conv2 output channels: 64 + 64
C3P = 128    # packed conv3 output channels: 64 + 64
OUT_W = 128  # lane-dense output slab width


def _round8(x):
    return -(-x // 8) * 8


# ----------------------------------------------------------------------------
# Static layout of the packed parameter slabs
# ----------------------------------------------------------------------------
def compute_dims(input1_shape, input2_shape, num_outputs):
    H, W = input1_shape
    oh1, ow1 = (H - K1) // S1 + 1, (W - K1) // S1 + 1
    oh2, ow2 = (oh1 - K2) // S2 + 1, (ow1 - K2) // S2 + 1
    oh3, ow3 = (oh2 - K3) // S3 + 1, (ow2 - K3) // S3 + 1
    # TODO(synk): the fused kernel assumes a 1x1 conv3 output (true for the
    # 36x36 minimum input); larger inputs would additionally need the
    # NCHW-flatten row permutation of the cnn-linear weight plus one more
    # in-kernel gather stage.
    assert oh3 == 1 and ow3 == 1, "fused kernel specialized to 1x1 conv3 output"
    assert num_outputs + 1 <= OUT_W
    return dict(n=num_outputs, input2=input2_shape,
                oh1=oh1, ow1=ow1, oh2=oh2, ow2=ow2, oh3=oh3, ow3=ow3,
                hw3=oh3 * ow3)


def weight_layouts(dims):
    """Row offsets of every packed weight inside the two weight slabs.

    Main slab: 128 lanes wide (single lane tile per read).  The two 40n-wide
    fc1 blocks (160 lanes at n=4) go into a small second slab so the main
    slab carries no dead lanes.
    """
    n, in2, hw3 = dims["n"], dims["input2"], dims["hw3"]
    main_entries = [
        ("cw1", K1 * K1 * 3, C1P),        # conv1, normalization folded in
        ("cw2", K2 * K2 * C1P, C2P),      # conv2, block-diag actor/critic
        ("cw3", K3 * K3 * C2P, C3P),      # conv3, block-diag actor/critic
        ("wc", hw3 * C3P, 10 * n),        # cnn->fc linear, block-diag
        ("w0", in2, 10 * n),              # fc0 (shared obs2 input)
        ("w2h", 40 * n, 20 * n),
        ("w3h", 20 * n, 10 * n),
        ("w4", 10 * n, OUT_W),            # fc4 (actor n cols + critic 1 col)
    ]
    wide_entries = [
        ("w1x1", 10 * n, 40 * n),         # fc1 rows that multiply x1
        ("w1x2", 10 * n, 40 * n),         # fc1 rows that multiply x2
    ]

    def build(entries):
        lay, row, width = {}, 0, 0
        for name, r, c in entries:
            lay[name] = (row, r, c)
            row += _round8(r)
            width = max(width, c)
        return lay, row, width

    main = build(main_entries)
    wide = build(wide_entries)
    assert main[2] <= 128, "main weight slab must stay one lane tile wide"
    return main, wide


def bias_layout(dims):
    n = dims["n"]
    entries = [("cb1", C1P), ("cb2", C2P), ("cb3", C3P), ("bc", 10 * n),
               ("b0", 10 * n), ("b1h", 40 * n), ("b2h", 20 * n),
               ("b3h", 10 * n), ("b4", OUT_W)]
    lay = {name: (i, c) for i, (name, c) in enumerate(entries)}
    return lay, len(entries), max(c for _, c in entries)


# ----------------------------------------------------------------------------
# The fused Pallas kernel (entire forward pass, both branches)
# ----------------------------------------------------------------------------
def _fused_kernel(p1_ref, obs2_ref, sel2_ref, w_ref, wide_ref, b_ref, out_ref,
                  *, wlay, widelay, blay, n, batch, oh2ow2, sel_blk):
    bf16 = jnp.bfloat16

    def mxu(a, b):
        # bf16 operands + f32 accumulate -> native MXU rate on v5e/v6e/v7x.
        return jnp.dot(a.astype(bf16), b.astype(bf16),
                       preferred_element_type=jnp.float32)

    def W(name):
        r0, nr, nc = wlay[name]
        return w_ref[pl.ds(r0, nr), pl.ds(0, nc)]

    def Wwide(name):
        r0, nr, nc = widelay[name]
        return wide_ref[pl.ds(r0, nr), pl.ds(0, nc)]

    def bias(name):
        row, nc = blay[name]
        return b_ref[pl.ds(row, 1), pl.ds(0, nc)]

    # conv1 + ReLU (input normalization already folded into cw1/cb1).
    y1 = jnp.maximum(mxu(p1_ref[...], W("cw1")) + bias("cb1"), 0.0)   # (R1, C1P)

    # conv2: ONE constant 0/1 selection matmul gathers all 16 receptive-field
    # row blocks of y1 at once (block j lives at rows [j*sel_blk, j*sel_blk+R2),
    # rows ordered spatial-major / batch-minor).  The 16 weight matmuls are
    # then mutually independent; 4 partial accumulators break the add chain.
    R2 = batch * oh2ow2
    G = mxu(sel2_ref[...], y1)                                        # (16*sel_blk, C1P)
    cw2_r0 = wlay["cw2"][0]
    partial = [None] * 4
    for j in range(K2 * K2):
        gj = G[j * sel_blk:j * sel_blk + R2, :]                       # sublane-aligned start
        wj = w_ref[pl.ds(cw2_r0 + j * C1P, C1P), pl.ds(0, C2P)]
        d = mxu(gj, wj)
        k = j % 4
        partial[k] = d if partial[k] is None else partial[k] + d
    y2 = jnp.maximum((partial[0] + partial[1]) + (partial[2] + partial[3])
                     + bias("cb2"), 0.0)                              # (R2, C2P)

    # conv3 (1x1 spatial output) collapsed into ONE matmul: because y2's rows
    # are spatial-major, the 9 receptive-field blocks of batch row b are the
    # contiguous slices y2[s*batch:(s+1)*batch]; lane-concatenating them (at
    # 128-aligned offsets) reproduces cw3's (kernel-position, channel) row
    # order.  K3*K3 == oh2*ow2 here since oh3 == ow3 == 1.
    feat_in = jnp.concatenate(
        [y2[s * batch:(s + 1) * batch, :] for s in range(K3 * K3)], axis=1)
    feat = jnp.maximum(mxu(feat_in, W("cw3")) + bias("cb3"), 0.0)     # (B, C3P)

    # Fused actor + critic MLP head (block-diagonally packed weights).
    x1 = mxu(feat, W("wc")) + bias("bc")                              # (B, 10n)
    x2 = jnp.maximum(mxu(obs2_ref[...], W("w0")) + bias("b0"), 0.0)   # (B, 10n)
    h = jnp.maximum(mxu(x1, Wwide("w1x1")) + mxu(x2, Wwide("w1x2"))
                    + bias("b1h"), 0.0)                               # (B, 40n)
    h = jnp.maximum(mxu(h, W("w2h")) + bias("b2h"), 0.0)              # (B, 20n)
    h = jnp.maximum(mxu(h, W("w3h")) + bias("b3h"), 0.0)              # (B, 10n)
    raw = mxu(h, W("w4")) + bias("b4")                                # (B, OUT_W)

    # Lane-dense output slab: lanes [0, n) = tanh(actor fc4) = mu,
    # lane n = critic value, remaining lanes are zero.
    lane = jax.lax.broadcasted_iota(jnp.int32, raw.shape, 1)
    out_ref[...] = jnp.where(lane < n, jnp.tanh(raw), raw)


# ----------------------------------------------------------------------------
# Wrapper glue
# ----------------------------------------------------------------------------
def _im2col(x, k, s):
    """x: (B, H, W, C) -> (B*OH*OW, k*k*C), patch columns ordered (KH, KW, C)."""
    B, H, W, C = x.shape
    OH = (H - k) // s + 1
    OW = (W - k) // s + 1
    cols = []
    for i in range(k):
        for j in range(k):
            cols.append(x[:, i:i + s * OH:s, j:j + s * OW:s, :])  # (B,OH,OW,C)
    patches = jnp.stack(cols, axis=3)                             # (B,OH,OW,k*k,C)
    return patches.reshape(B * OH * OW, k * k * C)


def _build_sel2(dims, batch):
    """Constant 0/1 selection matrix implementing the conv2 im2col gather.

    Block j = kernel position kh*K2+kw occupies rows [j*blk, j*blk+R2); rows
    within a block are ordered spatial-major / batch-minor so that conv3's
    receptive field is a contiguous row range of y2.  Blocks are padded to a
    multiple of 8 rows so in-kernel slices stay sublane-aligned.  0/1 values
    are exact in bf16.
    """
    oh1, ow1, oh2, ow2 = dims["oh1"], dims["ow1"], dims["oh2"], dims["ow2"]
    r1 = batch * oh1 * ow1
    r2 = batch * oh2 * ow2
    blk = _round8(r2)
    sel = np.zeros((K2 * K2 * blk, r1), np.float32)
    for kh in range(K2):
        for kw in range(K2):
            j = kh * K2 + kw
            for oh in range(oh2):
                for ow in range(ow2):
                    s = oh * ow2 + ow
                    for b in range(batch):
                        dst = j * blk + s * batch + b
                        src = (b * oh1 + S2 * oh + kh) * ow1 + (S2 * ow + kw)
                        sel[dst, src] = 1.0
    return jnp.asarray(sel, jnp.bfloat16), blk


def forward(img, obs2, packed, *, dims):
    # NOTE: for batched RL rollouts, stack observations into one call (larger
    # B) rather than calling per-observation -- the constant ~0.8 MB weight
    # DMA is then amortized, and on v7x a batch-parallel grid axis
    # (dimension_semantics=("parallel",)) can engage the second TensorCore.
    B = img.shape[0]
    n = dims["n"]
    (wlay, _, _), (widelay, _, _) = weight_layouts(dims)
    blay, _, _ = bias_layout(dims)

    # Shared-by-both-branches im2col of the raw image.  Pixel values are
    # integers in [0, 255] so the bf16 cast is bit-exact; (x - 127)/255 is
    # folded into cw1/cb1 at pack time.
    p1 = _im2col(img, K1, S1).astype(jnp.bfloat16)
    sel2, sel_blk = _build_sel2(dims, B)        # compile-time constant, bf16 exact

    kern = functools.partial(
        _fused_kernel, wlay=wlay, widelay=widelay, blay=blay,
        n=n, batch=B, oh2ow2=dims["oh2"] * dims["ow2"], sel_blk=sel_blk)

    # Advisory cost estimate so XLA schedules the surrounding ops sensibly.
    r1 = B * dims["oh1"] * dims["ow1"]
    r2 = B * dims["oh2"] * dims["ow2"]
    flops = 2 * (r1 * (K1 * K1 * 3) * C1P               # conv1
                 + sel2.shape[0] * r1 * C1P             # gather matmul
                 + K2 * K2 * r2 * C1P * C2P             # conv2
                 + B * (K3 * K3 * C2P) * C3P            # conv3
                 + B * (C3P * 10 * n + dims["input2"] * 10 * n
                        + 2 * (10 * n) * (40 * n) + (40 * n) * (20 * n)
                        + (20 * n) * (10 * n) + (10 * n) * OUT_W))
    args = (p1, obs2, sel2, packed["wslab"], packed["wslab_wide"], packed["bslab"])
    bytes_accessed = sum(int(a.size) * a.dtype.itemsize for a in args) + B * OUT_W * 4
    ce = pl.CostEstimate(flops=int(flops), transcendentals=B * OUT_W,
                         bytes_accessed=int(bytes_accessed))

    vmem = pl.BlockSpec(memory_space=pltpu.MemorySpace.VMEM)
    out = pl.pallas_call(
        kern,
        out_shape=jax.ShapeDtypeStruct((B, OUT_W), jnp.float32),
        in_specs=[vmem] * len(args),
        out_specs=vmem,
        cost_estimate=ce,
    )(*args)

    mu = out[:, :n]
    value = out[:, n:n + 1]
    # std depends only on parameters -> computed outside the kernel.
    std = jnp.broadcast_to(jnp.exp(packed["log_std"]), mu.shape)
    # TODO(synk): torch.distributions.Normal has no Pallas equivalent; we
    # return its parameters (mu, std) instead of a distribution object.
    return mu, std, value


# ----------------------------------------------------------------------------
# Parameter init (matching the PyTorch init scheme) and packing
# ----------------------------------------------------------------------------
def init_raw_params(key, dims, std=-0.5):
    n = dims["n"]
    feat_dim = dims["hw3"] * 64
    keys = iter(jax.random.split(key, 24))

    def linear(fan_in, fan_out):
        w = jax.random.normal(next(keys), (fan_in, fan_out), jnp.float32) * 0.1
        return w, jnp.full((fan_out,), 0.1, jnp.float32)

    def conv(k, cin, cout):
        fan_in, fan_out = cin * k * k, cout * k * k
        xavier = (2.0 / (fan_in + fan_out)) ** 0.5
        w = jax.random.normal(next(keys), (k * k * cin, cout), jnp.float32) * xavier
        return w, jnp.zeros((cout,), jnp.float32)

    def branch(last_out):
        return {"conv1": conv(K1, 3, 32), "conv2": conv(K2, 32, 64),
                "conv3": conv(K3, 64, 64),
                "fc_cnn": linear(feat_dim, 5 * n),
                "fc0": linear(dims["input2"], 5 * n),
                "fc1": linear(10 * n, 20 * n), "fc2": linear(20 * n, 10 * n),
                "fc3": linear(10 * n, 5 * n), "fc4": linear(5 * n, last_out)}

    return {"actor": branch(n), "critic": branch(1),
            "log_std": jnp.full((1, n), std, jnp.float32)}


def pack_params(raw, dims):
    n = dims["n"]
    (wlay, wrows, wwidth), (widelay, widerows, widewidth) = weight_layouts(dims)
    blay, brows, bwidth = bias_layout(dims)
    wslab = np.zeros((wrows, wwidth), np.float32)
    wide = np.zeros((widerows, widewidth), np.float32)
    bslab = np.zeros((brows, bwidth), np.float32)

    def put(slab, lay, name, arr):
        r0, nr, nc = lay[name]
        a = np.asarray(arr, np.float32)
        assert a.shape == (nr, nc), (name, a.shape, (nr, nc))
        slab[r0:r0 + nr, :nc] = a

    def put_b(name, vec):
        row, nc = blay[name]
        v = np.asarray(vec, np.float32).reshape(-1)
        assert v.size <= nc, (name, v.size, nc)
        bslab[row, :v.size] = v

    A, C = raw["actor"], raw["critic"]

    # conv1: shared input -> column concat; fold (x - 127)/255 into w & b.
    w1 = np.concatenate([np.asarray(A["conv1"][0]), np.asarray(C["conv1"][0])], axis=1)
    b1 = np.concatenate([np.asarray(A["conv1"][1]), np.asarray(C["conv1"][1])])
    put_b("cb1", b1 - (127.0 / 255.0) * w1.sum(axis=0))
    put(wslab, wlay, "cw1", w1 / 255.0)

    # conv2 / conv3: block-diagonal packing per kernel position.
    def pack_conv(wa, wc, cin_b, cout_b, ksq):
        wa, wc = np.asarray(wa), np.asarray(wc)
        wp = np.zeros((ksq * 2 * cin_b, 2 * cout_b), np.float32)
        for j in range(ksq):
            r = j * 2 * cin_b
            wp[r:r + cin_b, :cout_b] = wa[j * cin_b:(j + 1) * cin_b]
            wp[r + cin_b:r + 2 * cin_b, cout_b:] = wc[j * cin_b:(j + 1) * cin_b]
        return wp

    put(wslab, wlay, "cw2", pack_conv(A["conv2"][0], C["conv2"][0], 32, 64, K2 * K2))
    put_b("cb2", np.concatenate([np.asarray(A["conv2"][1]), np.asarray(C["conv2"][1])]))
    put(wslab, wlay, "cw3", pack_conv(A["conv3"][0], C["conv3"][0], 64, 64, K3 * K3))
    put_b("cb3", np.concatenate([np.asarray(A["conv3"][1]), np.asarray(C["conv3"][1])]))

    def blockdiag(wa, wc):
        wa, wc = np.asarray(wa), np.asarray(wc)
        out = np.zeros((wa.shape[0] + wc.shape[0], wa.shape[1] + wc.shape[1]), np.float32)
        out[:wa.shape[0], :wa.shape[1]] = wa
        out[wa.shape[0]:, wa.shape[1]:] = wc
        return out

    # cnn->fc linear (feat is channel-ordered since conv3 spatial is 1x1).
    put(wslab, wlay, "wc", blockdiag(A["fc_cnn"][0], C["fc_cnn"][0]))
    put_b("bc", np.concatenate([np.asarray(A["fc_cnn"][1]), np.asarray(C["fc_cnn"][1])]))
    # fc0 consumes the shared obs2 input -> plain column concat.
    put(wslab, wlay, "w0",
        np.concatenate([np.asarray(A["fc0"][0]), np.asarray(C["fc0"][0])], axis=1))
    put_b("b0", np.concatenate([np.asarray(A["fc0"][1]), np.asarray(C["fc0"][1])]))
    # fc1: split rows into the x1 part (first 5n) and the x2 part (last 5n).
    f1a, f1c = np.asarray(A["fc1"][0]), np.asarray(C["fc1"][0])
    put(wide, widelay, "w1x1", blockdiag(f1a[:5 * n], f1c[:5 * n]))
    put(wide, widelay, "w1x2", blockdiag(f1a[5 * n:], f1c[5 * n:]))
    put_b("b1h", np.concatenate([np.asarray(A["fc1"][1]), np.asarray(C["fc1"][1])]))
    put(wslab, wlay, "w2h", blockdiag(A["fc2"][0], C["fc2"][0]))
    put_b("b2h", np.concatenate([np.asarray(A["fc2"][1]), np.asarray(C["fc2"][1])]))
    put(wslab, wlay, "w3h", blockdiag(A["fc3"][0], C["fc3"][0]))
    put_b("b3h", np.concatenate([np.asarray(A["fc3"][1]), np.asarray(C["fc3"][1])]))
    # fc4: actor -> lanes [0, n), critic value -> lane n; rest zero-padded.
    f4 = np.zeros((10 * n, OUT_W), np.float32)
    f4[:5 * n, :n] = np.asarray(A["fc4"][0])
    f4[5 * n:, n:n + 1] = np.asarray(C["fc4"][0])
    put(wslab, wlay, "w4", f4)
    b4 = np.zeros((OUT_W,), np.float32)
    b4[:n] = np.asarray(A["fc4"][1])
    b4[n] = np.asarray(C["fc4"][1])[0]
    put_b("b4", b4)

    # Weight slabs in bf16 (halves HBM->VMEM DMA, native MXU rate); biases in
    # f32 (tiny, keeps elementwise math f32 on v5e).
    return {"wslab": jnp.asarray(wslab, jnp.bfloat16),
            "wslab_wide": jnp.asarray(wide, jnp.bfloat16),
            "bslab": jnp.asarray(bslab),
            "log_std": raw["log_std"]}


# ----------------------------------------------------------------------------
# Pure-JAX reference of the PyTorch forward (for a correctness check)
# ----------------------------------------------------------------------------
def reference_forward(img, obs2, raw):
    def conv(x, w, b, k, s):
        B, H, W, _ = x.shape
        oh, ow = (H - k) // s + 1, (W - k) // s + 1
        y = jnp.dot(_im2col(x, k, s), w) + b
        return y.reshape(B, oh, ow, w.shape[1])

    x0 = (img - 127.0) / 255.0

    def branch(p):
        y = jax.nn.relu(conv(x0, *p["conv1"], K1, S1))
        y = jax.nn.relu(conv(y, *p["conv2"], K2, S2))
        y = conv(y, *p["conv3"], K3, S3)
        B = y.shape[0]
        feat = jnp.transpose(y, (0, 3, 1, 2)).reshape(B, -1)   # torch NCHW flatten
        x1 = jnp.dot(jax.nn.relu(feat), p["fc_cnn"][0]) + p["fc_cnn"][1]
        x2 = jax.nn.relu(jnp.dot(obs2, p["fc0"][0]) + p["fc0"][1])
        h = jnp.concatenate([x1, x2], axis=1)
        h = jax.nn.relu(jnp.dot(h, p["fc1"][0]) + p["fc1"][1])
        h = jax.nn.relu(jnp.dot(h, p["fc2"][0]) + p["fc2"][1])
        h = jax.nn.relu(jnp.dot(h, p["fc3"][0]) + p["fc3"][1])
        return jnp.dot(h, p["fc4"][0]) + p["fc4"][1]

    mu = jnp.tanh(branch(raw["actor"]))
    value = branch(raw["critic"])
    std = jnp.broadcast_to(jnp.exp(raw["log_std"]), mu.shape)
    return mu, std, value


# ----------------------------------------------------------------------------
if __name__ == "__main__":
    B = 2
    H = W = 36            # smallest spatial size the 8/4, 4/2, 3/1 conv stack admits
    INPUT2 = 8
    NUM_OUTPUTS = 4

    key = jax.random.PRNGKey(0)
    k_params, k_img, k_obs = jax.random.split(key, 3)

    dims = compute_dims((H, W), INPUT2, NUM_OUTPUTS)
    raw = init_raw_params(k_params, dims, std=-0.5)
    packed = pack_params(raw, dims)

    # Integer pixel values (as produced by a uint8 camera buffer): the bf16
    # cast of the im2col patches is then bit-exact.
    img = jax.random.randint(k_img, (B, H, W, 3), 0, 256).astype(jnp.float32)
    obs2 = jax.random.normal(k_obs, (B, INPUT2), jnp.float32)

    fwd = jax.jit(functools.partial(forward, dims=dims))
    mu, std_out, value = fwd(img, obs2, packed)
    jax.block_until_ready((mu, std_out, value))

    assert mu.shape == (B, NUM_OUTPUTS)
    assert std_out.shape == (B, NUM_OUTPUTS)
    assert value.shape == (B, 1)

    # Correctness check against the straightforward f32 JAX port of the module.
    # Packed weights are stored in bf16, so the tolerance is slightly looser
    # than the all-f32 variant (activations / accumulation stay f32).
    mu_r, std_r, value_r = reference_forward(img, obs2, raw)
    assert jnp.allclose(mu, mu_r, rtol=2e-2, atol=2e-2), (mu, mu_r)
    assert jnp.allclose(std_out, std_r, rtol=1e-5, atol=1e-6)
    assert jnp.allclose(value, value_r, rtol=2e-2, atol=2e-2), (value, value_r)

    print("KERNEL_OK")
</pallas_src>

<mosaic_0001>
module attributes {stable_mosaic.version = 11 : i64} {
  func.func @_fused_kernel(%arg0: memref<128x192xbf16, #tpu.memory_space<vmem>>, %arg1: memref<2x8xf32, #tpu.memory_space<vmem>>, %arg2: memref<384x128xbf16, #tpu.memory_space<vmem>>, %arg3: memref<2784x128xbf16, #tpu.memory_space<vmem>>, %arg4: memref<80x160xbf16, #tpu.memory_space<vmem>>, %arg5: memref<9x160xf32, #tpu.memory_space<vmem>>, %arg6: memref<2x128xf32, #tpu.memory_space<vmem>>) attributes {dimension_semantics = [], scalar_prefetch = 0 : i64, scratch_operands = 0 : i64, tpu.core_type = #tpu.core_type<tc>} {
    %c0 = arith.constant 0 : index
    %c0_0 = arith.constant 0 : index
    %0 = vector.load %arg0[%c0, %c0_0] : memref<128x192xbf16, #tpu.memory_space<vmem>>, vector<128x192xbf16>
    %c0_1 = arith.constant 0 : index
    %c0_2 = arith.constant 0 : index
    %1 = vector.load %arg3[%c0_1, %c0_2] : memref<2784x128xbf16, #tpu.memory_space<vmem>>, vector<192x64xbf16>
    %cst = arith.constant dense<0.000000e+00> : vector<128x64xf32>
    %2 = tpu.matmul %0, %1, %cst {dimension_numbers = #tpu.dot_dimension_numbers<[1], [0], [0], [1], [0, 0, 1, 1], [], []>} : vector<128x192xbf16>, vector<192x64xbf16>, vector<128x64xf32> -> vector<128x64xf32>
    %c0_3 = arith.constant 0 : index
    %c0_4 = arith.constant 0 : index
    %3 = vector.load %arg5[%c0_3, %c0_4] : memref<9x160xf32, #tpu.memory_space<vmem>>, vector<1x64xf32>
    %4 = vector.broadcast %3 : vector<1x64xf32> to vector<128x64xf32>
    %5 = arith.addf %2, %4 : vector<128x64xf32>
    %cst_5 = arith.constant 0.000000e+00 : f32
    %6 = vector.broadcast %cst_5 : f32 to vector<128x64xf32>
    %7 = arith.maximumf %5, %6 : vector<128x64xf32>
    %c0_6 = arith.constant 0 : index
    %c0_7 = arith.constant 0 : index
    %8 = vector.load %arg2[%c0_6, %c0_7] : memref<384x128xbf16, #tpu.memory_space<vmem>>, vector<384x128xbf16>
    %9 = arith.truncf %7 : vector<128x64xf32> to vector<128x64xbf16>
    %cst_8 = arith.constant dense<0.000000e+00> : vector<384x64xf32>
    %10 = tpu.matmul %8, %9, %cst_8 {dimension_numbers = #tpu.dot_dimension_numbers<[1], [0], [0], [1], [0, 0, 1, 1], [], []>} : vector<384x128xbf16>, vector<128x64xbf16>, vector<384x64xf32> -> vector<384x64xf32>
    %11 = vector.extract_strided_slice %10 {offsets = [0, 0], sizes = [18, 64], strides = [1, 1]} : vector<384x64xf32> to vector<18x64xf32>
    %c192 = arith.constant 192 : index
    %c0_9 = arith.constant 0 : index
    %12 = vector.load %arg3[%c192, %c0_9] : memref<2784x128xbf16, #tpu.memory_space<vmem>>, vector<64x128xbf16>
    %13 = arith.truncf %11 : vector<18x64xf32> to vector<18x64xbf16>
    %cst_10 = arith.constant dense<0.000000e+00> : vector<18x128xf32>
    %14 = tpu.matmul %13, %12, %cst_10 {dimension_numbers = #tpu.dot_dimension_numbers<[1], [0], [0], [1], [0, 0, 1, 1], [], []>} : vector<18x64xbf16>, vector<64x128xbf16>, vector<18x128xf32> -> vector<18x128xf32>
    %15 = vector.extract_strided_slice %10 {offsets = [24, 0], sizes = [18, 64], strides = [1, 1]} : vector<384x64xf32> to vector<18x64xf32>
    %c256 = arith.constant 256 : index
    %c0_11 = arith.constant 0 : index
    %16 = vector.load %arg3[%c256, %c0_11] : memref<2784x128xbf16, #tpu.memory_space<vmem>>, vector<64x128xbf16>
    %17 = arith.truncf %15 : vector<18x64xf32> to vector<18x64xbf16>
    %cst_12 = arith.constant dense<0.000000e+00> : vector<18x128xf32>
    %18 = tpu.matmul %17, %16, %cst_12 {dimension_numbers = #tpu.dot_dimension_numbers<[1], [0], [0], [1], [0, 0, 1, 1], [], []>} : vector<18x64xbf16>, vector<64x128xbf16>, vector<18x128xf32> -> vector<18x128xf32>
    %19 = vector.extract_strided_slice %10 {offsets = [48, 0], sizes = [18, 64], strides = [1, 1]} : vector<384x64xf32> to vector<18x64xf32>
    %c320 = arith.constant 320 : index
    %c0_13 = arith.constant 0 : index
    %20 = vector.load %arg3[%c320, %c0_13] : memref<2784x128xbf16, #tpu.memory_space<vmem>>, vector<64x128xbf16>
    %21 = arith.truncf %19 : vector<18x64xf32> to vector<18x64xbf16>
    %cst_14 = arith.constant dense<0.000000e+00> : vector<18x128xf32>
    %22 = tpu.matmul %21, %20, %cst_14 {dimension_numbers = #tpu.dot_dimension_numbers<[1], [0], [0], [1], [0, 0, 1, 1], [], []>} : vector<18x64xbf16>, vector<64x128xbf16>, vector<18x128xf32> -> vector<18x128xf32>
    %23 = vector.extract_strided_slice %10 {offsets = [72, 0], sizes = [18, 64], strides = [1, 1]} : vector<384x64xf32> to vector<18x64xf32>
    %c384 = arith.constant 384 : index
    %c0_15 = arith.constant 0 : index
    %24 = vector.load %arg3[%c384, %c0_15] : memref<2784x128xbf16, #tpu.memory_space<vmem>>, vector<64x128xbf16>
    %25 = arith.truncf %23 : vector<18x64xf32> to vector<18x64xbf16>
    %cst_16 = arith.constant dense<0.000000e+00> : vector<18x128xf32>
    %26 = tpu.matmul %25, %24, %cst_16 {dimension_numbers = #tpu.dot_dimension_numbers<[1], [0], [0], [1], [0, 0, 1, 1], [], []>} : vector<18x64xbf16>, vector<64x128xbf16>, vector<18x128xf32> -> vector<18x128xf32>
    %27 = vector.extract_strided_slice %10 {offsets = [96, 0], sizes = [18, 64], strides = [1, 1]} : vector<384x64xf32> to vector<18x64xf32>
    %c448 = arith.constant 448 : index
    %c0_17 = arith.constant 0 : index
    %28 = vector.load %arg3[%c448, %c0_17] : memref<2784x128xbf16, #tpu.memory_space<vmem>>, vector<64x128xbf16>
    %29 = arith.truncf %27 : vector<18x64xf32> to vector<18x64xbf16>
    %cst_18 = arith.constant dense<0.000000e+00> : vector<18x128xf32>
    %30 = tpu.matmul %29, %28, %cst_18 {dimension_numbers = #tpu.dot_dimension_numbers<[1], [0], [0], [1], [0, 0, 1, 1], [], []>} : vector<18x64xbf16>, vector<64x128xbf16>, vector<18x128xf32> -> vector<18x128xf32>
    %31 = arith.addf %14, %30 : vector<18x128xf32>
    %32 = vector.extract_strided_slice %10 {offsets = [120, 0], sizes = [18, 64], strides = [1, 1]} : vector<384x64xf32> to vector<18x64xf32>
    %c512 = arith.constant 512 : index
    %c0_19 = arith.constant 0 : index
    %33 = vector.load %arg3[%c512, %c0_19] : memref<2784x128xbf16, #tpu.memory_space<vmem>>, vector<64x128xbf16>
    %34 = arith.truncf %32 : vector<18x64xf32> to vector<18x64xbf16>
    %cst_20 = arith.constant dense<0.000000e+00> : vector<18x128xf32>
    %35 = tpu.matmul %34, %33, %cst_20 {dimension_numbers = #tpu.dot_dimension_numbers<[1], [0], [0], [1], [0, 0, 1, 1], [], []>} : vector<18x64xbf16>, vector<64x128xbf16>, vector<18x128xf32> -> vector<18x128xf32>
    %36 = arith.addf %18, %35 : vector<18x128xf32>
    %37 = vector.extract_strided_slice %10 {offsets = [144, 0], sizes = [18, 64], strides = [1, 1]} : vector<384x64xf32> to vector<18x64xf32>
    %c576 = arith.constant 576 : index
    %c0_21 = arith.constant 0 : index
    %38 = vector.load %arg3[%c576, %c0_21] : memref<2784x128xbf16, #tpu.memory_space<vmem>>, vector<64x128xbf16>
    %39 = arith.truncf %37 : vector<18x64xf32> to vector<18x64xbf16>
    %cst_22 = arith.constant dense<0.000000e+00> : vector<18x128xf32>
    %40 = tpu.matmul %39, %38, %cst_22 {dimension_numbers = #tpu.dot_dimension_numbers<[1], [0], [0], [1], [0, 0, 1, 1], [], []>} : vector<18x64xbf16>, vector<64x128xbf16>, vector<18x128xf32> -> vector<18x128xf32>
    %41 = arith.addf %22, %40 : vector<18x128xf32>
    %42 = vector.extract_strided_slice %10 {offsets = [168, 0], sizes = [18, 64], strides = [1, 1]} : vector<384x64xf32> to vector<18x64xf32>
    %c640 = arith.constant 640 : index
    %c0_23 = arith.constant 0 : index
    %43 = vector.load %arg3[%c640, %c0_23] : memref<2784x128xbf16, #tpu.memory_space<vmem>>, vector<64x128xbf16>
    %44 = arith.truncf %42 : vector<18x64xf32> to vector<18x64xbf16>
    %cst_24 = arith.constant dense<0.000000e+00> : vector<18x128xf32>
    %45 = tpu.matmul %44, %43, %cst_24 {dimension_numbers = #tpu.dot_dimension_numbers<[1], [0], [0], [1], [0, 0, 1, 1], [], []>} : vector<18x64xbf16>, vector<64x128xbf16>, vector<18x128xf32> -> vector<18x128xf32>
    %46 = arith.addf %26, %45 : vector<18x128xf32>
    %47 = vector.extract_strided_slice %10 {offsets = [192, 0], sizes = [18, 64], strides = [1, 1]} : vector<384x64xf32> to vector<18x64xf32>
    %c704 = arith.constant 704 : index
    %c0_25 = arith.constant 0 : index
    %48 = vector.load %arg3[%c704, %c0_25] : memref<2784x128xbf16, #tpu.memory_space<vmem>>, vector<64x128xbf16>
    %49 = arith.truncf %47 : vector<18x64xf32> to vector<18x64xbf16>
    %cst_26 = arith.constant dense<0.000000e+00> : vector<18x128xf32>
    %50 = tpu.matmul %49, %48, %cst_26 {dimension_numbers = #tpu.dot_dimension_numbers<[1], [0], [0], [1], [0, 0, 1, 1], [], []>} : vector<18x64xbf16>, vector<64x128xbf16>, vector<18x128xf32> -> vector<18x128xf32>
    %51 = arith.addf %31, %50 : vector<18x128xf32>
    %52 = vector.extract_strided_slice %10 {offsets = [216, 0], sizes = [18, 64], strides = [1, 1]} : vector<384x64xf32> to vector<18x64xf32>
    %c768 = arith.constant 768 : index
    %c0_27 = arith.constant 0 : index
    %53 = vector.load %arg3[%c768, %c0_27] : memref<2784x128xbf16, #tpu.memory_space<vmem>>, vector<64x128xbf16>
    %54 = arith.truncf %52 : vector<18x64xf32> to vector<18x64xbf16>
    %cst_28 = arith.constant dense<0.000000e+00> : vector<18x128xf32>
    %55 = tpu.matmul %54, %53, %cst_28 {dimension_numbers = #tpu.dot_dimension_numbers<[1], [0], [0], [1], [0, 0, 1, 1], [], []>} : vector<18x64xbf16>, vector<64x128xbf16>, vector<18x128xf32> -> vector<18x128xf32>
    %56 = arith.addf %36, %55 : vector<18x128xf32>
    %57 = vector.extract_strided_slice %10 {offsets = [240, 0], sizes = [18, 64], strides = [1, 1]} : vector<384x64xf32> to vector<18x64xf32>
    %c832 = arith.constant 832 : index
    %c0_29 = arith.constant 0 : index
    %58 = vector.load %arg3[%c832, %c0_29] : memref<2784x128xbf16, #tpu.memory_space<vmem>>, vector<64x128xbf16>
    %59 = arith.truncf %57 : vector<18x64xf32> to vector<18x64xbf16>
    %cst_30 = arith.constant dense<0.000000e+00> : vector<18x128xf32>
    %60 = tpu.matmul %59, %58, %cst_30 {dimension_numbers = #tpu.dot_dimension_numbers<[1], [0], [0], [1], [0, 0, 1, 1], [], []>} : vector<18x64xbf16>, vector<64x128xbf16>, vector<18x128xf32> -> vector<18x128xf32>
    %61 = arith.addf %41, %60 : vector<18x128xf32>
    %62 = vector.extract_strided_slice %10 {offsets = [264, 0], sizes = [18, 64], strides = [1, 1]} : vector<384x64xf32> to vector<18x64xf32>
    %c896 = arith.constant 896 : index
    %c0_31 = arith.constant 0 : index
    %63 = vector.load %arg3[%c896, %c0_31] : memref<2784x128xbf16, #tpu.memory_space<vmem>>, vector<64x128xbf16>
    %64 = arith.truncf %62 : vector<18x64xf32> to vector<18x64xbf16>
    %cst_32 = arith.constant dense<0.000000e+00> : vector<18x128xf32>
    %65 = tpu.matmul %64, %63, %cst_32 {dimension_numbers = #tpu.dot_dimension_numbers<[1], [0], [0], [1], [0, 0, 1, 1], [], []>} : vector<18x64xbf16>, vector<64x128xbf16>, vector<18x128xf32> -> vector<18x128xf32>
    %66 = arith.addf %46, %65 : vector<18x128xf32>
    %67 = vector.extract_strided_slice %10 {offsets = [288, 0], sizes = [18, 64], strides = [1, 1]} : vector<384x64xf32> to vector<18x64xf32>
    %c960 = arith.constant 960 : index
    %c0_33 = arith.constant 0 : index
    %68 = vector.load %arg3[%c960, %c0_33] : memref<2784x128xbf16, #tpu.memory_space<vmem>>, vector<64x128xbf16>
    %69 = arith.truncf %67 : vector<18x64xf32> to vector<18x64xbf16>
    %cst_34 = arith.constant dense<0.000000e+00> : vector<18x128xf32>
    %70 = tpu.matmul %69, %68, %cst_34 {dimension_numbers = #tpu.dot_dimension_numbers<[1], [0], [0], [1], [0, 0, 1, 1], [], []>} : vector<18x64xbf16>, vector<64x128xbf16>, vector<18x128xf32> -> vector<18x128xf32>
    %71 = arith.addf %51, %70 : vector<18x128xf32>
    %72 = vector.extract_strided_slice %10 {offsets = [312, 0], sizes = [18, 64], strides = [1, 1]} : vector<384x64xf32> to vector<18x64xf32>
    %c1024 = arith.constant 1024 : index
    %c0_35 = arith.constant 0 : index
    %73 = vector.load %arg3[%c1024, %c0_35] : memref<2784x128xbf16, #tpu.memory_space<vmem>>, vector<64x128xbf16>
    %74 = arith.truncf %72 : vector<18x64xf32> to vector<18x64xbf16>
    %cst_36 = arith.constant dense<0.000000e+00> : vector<18x128xf32>
    %75 = tpu.matmul %74, %73, %cst_36 {dimension_numbers = #tpu.dot_dimension_numbers<[1], [0], [0], [1], [0, 0, 1, 1], [], []>} : vector<18x64xbf16>, vector<64x128xbf16>, vector<18x128xf32> -> vector<18x128xf32>
    %76 = arith.addf %56, %75 : vector<18x128xf32>
    %77 = vector.extract_strided_slice %10 {offsets = [336, 0], sizes = [18, 64], strides = [1, 1]} : vector<384x64xf32> to vector<18x64xf32>
    %c1088 = arith.constant 1088 : index
    %c0_37 = arith.constant 0 : index
    %78 = vector.load %arg3[%c1088, %c0_37] : memref<2784x128xbf16, #tpu.memory_space<vmem>>, vector<64x128xbf16>
    %79 = arith.truncf %77 : vector<18x64xf32> to vector<18x64xbf16>
    %cst_38 = arith.constant dense<0.000000e+00> : vector<18x128xf32>
    %80 = tpu.matmul %79, %78, %cst_38 {dimension_numbers = #tpu.dot_dimension_numbers<[1], [0], [0], [1], [0, 0, 1, 1], [], []>} : vector<18x64xbf16>, vector<64x128xbf16>, vector<18x128xf32> -> vector<18x128xf32>
    %81 = arith.addf %61, %80 : vector<18x128xf32>
    %82 = vector.extract_strided_slice %10 {offsets = [360, 0], sizes = [18, 64], strides = [1, 1]} : vector<384x64xf32> to vector<18x64xf32>
    %c1152 = arith.constant 1152 : index
    %c0_39 = arith.constant 0 : index
    %83 = vector.load %arg3[%c1152, %c0_39] : memref<2784x128xbf16, #tpu.memory_space<vmem>>, vector<64x128xbf16>
    %84 = arith.truncf %82 : vector<18x64xf32> to vector<18x64xbf16>
    %cst_40 = arith.constant dense<0.000000e+00> : vector<18x128xf32>
    %85 = tpu.matmul %84, %83, %cst_40 {dimension_numbers = #tpu.dot_dimension_numbers<[1], [0], [0], [1], [0, 0, 1, 1], [], []>} : vector<18x64xbf16>, vector<64x128xbf16>, vector<18x128xf32> -> vector<18x128xf32>
    %86 = arith.addf %66, %85 : vector<18x128xf32>
    %87 = arith.addf %71, %76 : vector<18x128xf32>
    %88 = arith.addf %81, %86 : vector<18x128xf32>
    %89 = arith.addf %87, %88 : vector<18x128xf32>
    %c1 = arith.constant 1 : index
    %c0_41 = arith.constant 0 : index
    %90 = vector.load %arg5[%c1, %c0_41] : memref<9x160xf32, #tpu.memory_space<vmem>>, vector<1x128xf32>
    %91 = vector.broadcast %90 : vector<1x128xf32> to vector<18x128xf32>
    %92 = arith.addf %89, %91 : vector<18x128xf32>
    %cst_42 = arith.constant 0.000000e+00 : f32
    %93 = vector.broadcast %cst_42 : f32 to vector<18x128xf32>
    %94 = arith.maximumf %92, %93 : vector<18x128xf32>
    %95 = vector.extract_strided_slice %94 {offsets = [0, 0], sizes = [2, 128], strides = [1, 1]} : vector<18x128xf32> to vector<2x128xf32>
    %96 = vector.extract_strided_slice %94 {offsets = [2, 0], sizes = [2, 128], strides = [1, 1]} : vector<18x128xf32> to vector<2x128xf32>
    %97 = vector.extract_strided_slice %94 {offsets = [4, 0], sizes = [2, 128], strides = [1, 1]} : vector<18x128xf32> to vector<2x128xf32>
    %98 = vector.extract_strided_slice %94 {offsets = [6, 0], sizes = [2, 128], strides = [1, 1]} : vector<18x128xf32> to vector<2x128xf32>
    %99 = vector.extract_strided_slice %94 {offsets = [8, 0], sizes = [2, 128], strides = [1, 1]} : vector<18x128xf32> to vector<2x128xf32>
    %100 = vector.extract_strided_slice %94 {offsets = [10, 0], sizes = [2, 128], strides = [1, 1]} : vector<18x128xf32> to vector<2x128xf32>
    %101 = vector.extract_strided_slice %94 {offsets = [12, 0], sizes = [2, 128], strides = [1, 1]} : vector<18x128xf32> to vector<2x128xf32>
    %102 = vector.extract_strided_slice %94 {offsets = [14, 0], sizes = [2, 128], strides = [1, 1]} : vector<18x128xf32> to vector<2x128xf32>
    %103 = vector.extract_strided_slice %94 {offsets = [16, 0], sizes = [2, 128], strides = [1, 1]} : vector<18x128xf32> to vector<2x128xf32>
    %104 = tpu.concatenate %95, %96, %97, %98, %99, %100, %101, %102, %103 in 1 : vector<2x128xf32>, vector<2x128xf32>, vector<2x128xf32>, vector<2x128xf32>, vector<2x128xf32>, vector<2x128xf32>, vector<2x128xf32>, vector<2x128xf32>, vector<2x128xf32> -> vector<2x1152xf32>
    %c1216 = arith.constant 1216 : index
    %c0_43 = arith.constant 0 : index
    %105 = vector.load %arg3[%c1216, %c0_43] : memref<2784x128xbf16, #tpu.memory_space<vmem>>, vector<1152x128xbf16>
    %106 = arith.truncf %104 : vector<2x1152xf32> to vector<2x1152xbf16>
    %cst_44 = arith.constant dense<0.000000e+00> : vector<2x128xf32>
    %107 = tpu.matmul %106, %105, %cst_44 {dimension_numbers = #tpu.dot_dimension_numbers<[1], [0], [0], [1], [0, 0, 1, 1], [], []>} : vector<2x1152xbf16>, vector<1152x128xbf16>, vector<2x128xf32> -> vector<2x128xf32>
    %c2 = arith.constant 2 : index
    %c0_45 = arith.constant 0 : index
    %108 = vector.load %arg5[%c2, %c0_45] : memref<9x160xf32, #tpu.memory_space<vmem>>, vector<1x128xf32>
    %109 = vector.broadcast %108 : vector<1x128xf32> to vector<2x128xf32>
    %110 = arith.addf %107, %109 : vector<2x128xf32>
    %cst_46 = arith.constant 0.000000e+00 : f32
    %111 = vector.broadcast %cst_46 : f32 to vector<2x128xf32>
    %112 = arith.maximumf %110, %111 : vector<2x128xf32>
    %c2368 = arith.constant 2368 : index
    %c0_47 = arith.constant 0 : index
    %113 = vector.load %arg3[%c2368, %c0_47] : memref<2784x128xbf16, #tpu.memory_space<vmem>>, vector<128x40xbf16>
    %114 = arith.truncf %112 : vector<2x128xf32> to vector<2x128xbf16>
    %cst_48 = arith.constant dense<0.000000e+00> : vector<2x40xf32>
    %115 = tpu.matmul %114, %113, %cst_48 {dimension_numbers = #tpu.dot_dimension_numbers<[1], [0], [0], [1], [0, 0, 1, 1], [], []>} : vector<2x128xbf16>, vector<128x40xbf16>, vector<2x40xf32> -> vector<2x40xf32>
    %c3 = arith.constant 3 : index
    %c0_49 = arith.constant 0 : index
    %116 = vector.load %arg5[%c3, %c0_49] : memref<9x160xf32, #tpu.memory_space<vmem>>, vector<1x40xf32>
    %117 = vector.broadcast %116 : vector<1x40xf32> to vector<2x40xf32>
    %118 = arith.addf %115, %117 : vector<2x40xf32>
    %c0_50 = arith.constant 0 : index
    %c0_51 = arith.constant 0 : index
    %119 = vector.load %arg1[%c0_50, %c0_51] : memref<2x8xf32, #tpu.memory_space<vmem>>, vector<2x8xf32>
    %c2496 = arith.constant 2496 : index
    %c0_52 = arith.constant 0 : index
    %120 = vector.load %arg3[%c2496, %c0_52] : memref<2784x128xbf16, #tpu.memory_space<vmem>>, vector<8x40xbf16>
    %121 = arith.truncf %119 : vector<2x8xf32> to vector<2x8xbf16>
    %cst_53 = arith.constant dense<0.000000e+00> : vector<2x40xf32>
    %122 = tpu.matmul %121, %120, %cst_53 {dimension_numbers = #tpu.dot_dimension_numbers<[1], [0], [0], [1], [0, 0, 1, 1], [], []>} : vector<2x8xbf16>, vector<8x40xbf16>, vector<2x40xf32> -> vector<2x40xf32>
    %c4 = arith.constant 4 : index
    %c0_54 = arith.constant 0 : index
    %123 = vector.load %arg5[%c4, %c0_54] : memref<9x160xf32, #tpu.memory_space<vmem>>, vector<1x40xf32>
    %124 = vector.broadcast %123 : vector<1x40xf32> to vector<2x40xf32>
    %125 = arith.addf %122, %124 : vector<2x40xf32>
    %cst_55 = arith.constant 0.000000e+00 : f32
    %126 = vector.broadcast %cst_55 : f32 to vector<2x40xf32>
    %127 = arith.maximumf %125, %126 : vector<2x40xf32>
    %c0_56 = arith.constant 0 : index
    %c0_57 = arith.constant 0 : index
    %128 = vector.load %arg4[%c0_56, %c0_57] : memref<80x160xbf16, #tpu.memory_space<vmem>>, vector<40x160xbf16>
    %129 = arith.truncf %118 : vector<2x40xf32> to vector<2x40xbf16>
    %cst_58 = arith.constant dense<0.000000e+00> : vector<2x160xf32>
    %130 = tpu.matmul %129, %128, %cst_58 {dimension_numbers = #tpu.dot_dimension_numbers<[1], [0], [0], [1], [0, 0, 1, 1], [], []>} : vector<2x40xbf16>, vector<40x160xbf16>, vector<2x160xf32> -> vector<2x160xf32>
    %c40 = arith.constant 40 : index
    %c0_59 = arith.constant 0 : index
    %131 = vector.load %arg4[%c40, %c0_59] : memref<80x160xbf16, #tpu.memory_space<vmem>>, vector<40x160xbf16>
    %132 = arith.truncf %127 : vector<2x40xf32> to vector<2x40xbf16>
    %cst_60 = arith.constant dense<0.000000e+00> : vector<2x160xf32>
    %133 = tpu.matmul %132, %131, %cst_60 {dimension_numbers = #tpu.dot_dimension_numbers<[1], [0], [0], [1], [0, 0, 1, 1], [], []>} : vector<2x40xbf16>, vector<40x160xbf16>, vector<2x160xf32> -> vector<2x160xf32>
    %134 = arith.addf %130, %133 : vector<2x160xf32>
    %c5 = arith.constant 5 : index
    %c0_61 = arith.constant 0 : index
    %135 = vector.load %arg5[%c5, %c0_61] : memref<9x160xf32, #tpu.memory_space<vmem>>, vector<1x160xf32>
    %136 = vector.broadcast %135 : vector<1x160xf32> to vector<2x160xf32>
    %137 = arith.addf %134, %136 : vector<2x160xf32>
    %cst_62 = arith.constant 0.000000e+00 : f32
    %138 = vector.broadcast %cst_62 : f32 to vector<2x160xf32>
    %139 = arith.maximumf %137, %138 : vector<2x160xf32>
    %c2504 = arith.constant 2504 : index
    %c0_63 = arith.constant 0 : index
    %140 = vector.load %arg3[%c2504, %c0_63] : memref<2784x128xbf16, #tpu.memory_space<vmem>>, vector<160x80xbf16>
    %141 = arith.truncf %139 : vector<2x160xf32> to vector<2x160xbf16>
    %cst_64 = arith.constant dense<0.000000e+00> : vector<2x80xf32>
    %142 = tpu.matmul %141, %140, %cst_64 {dimension_numbers = #tpu.dot_dimension_numbers<[1], [0], [0], [1], [0, 0, 1, 1], [], []>} : vector<2x160xbf16>, vector<160x80xbf16>, vector<2x80xf32> -> vector<2x80xf32>
    %c6 = arith.constant 6 : index
    %c0_65 = arith.constant 0 : index
    %143 = vector.load %arg5[%c6, %c0_65] : memref<9x160xf32, #tpu.memory_space<vmem>>, vector<1x80xf32>
    %144 = vector.broadcast %143 : vector<1x80xf32> to vector<2x80xf32>
    %145 = arith.addf %142, %144 : vector<2x80xf32>
    %cst_66 = arith.constant 0.000000e+00 : f32
    %146 = vector.broadcast %cst_66 : f32 to vector<2x80xf32>
    %147 = arith.maximumf %145, %146 : vector<2x80xf32>
    %c2664 = arith.constant 2664 : index
    %c0_67 = arith.constant 0 : index
    %148 = vector.load %arg3[%c2664, %c0_67] : memref<2784x128xbf16, #tpu.memory_space<vmem>>, vector<80x40xbf16>
    %149 = arith.truncf %147 : vector<2x80xf32> to vector<2x80xbf16>
    %cst_68 = arith.constant dense<0.000000e+00> : vector<2x40xf32>
    %150 = tpu.matmul %149, %148, %cst_68 {dimension_numbers = #tpu.dot_dimension_numbers<[1], [0], [0], [1], [0, 0, 1, 1], [], []>} : vector<2x80xbf16>, vector<80x40xbf16>, vector<2x40xf32> -> vector<2x40xf32>
    %c7 = arith.constant 7 : index
    %c0_69 = arith.constant 0 : index
    %151 = vector.load %arg5[%c7, %c0_69] : memref<9x160xf32, #tpu.memory_space<vmem>>, vector<1x40xf32>
    %152 = vector.broadcast %151 : vector<1x40xf32> to vector<2x40xf32>
    %153 = arith.addf %150, %152 : vector<2x40xf32>
    %cst_70 = arith.constant 0.000000e+00 : f32
    %154 = vector.broadcast %cst_70 : f32 to vector<2x40xf32>
    %155 = arith.maximumf %153, %154 : vector<2x40xf32>
    %c2744 = arith.constant 2744 : index
    %c0_71 = arith.constant 0 : index
    %156 = vector.load %arg3[%c2744, %c0_71] : memref<2784x128xbf16, #tpu.memory_space<vmem>>, vector<40x128xbf16>
    %157 = arith.truncf %155 : vector<2x40xf32> to vector<2x40xbf16>
    %cst_72 = arith.constant dense<0.000000e+00> : vector<2x128xf32>
    %158 = tpu.matmul %157, %156, %cst_72 {dimension_numbers = #tpu.dot_dimension_numbers<[1], [0], [0], [1], [0, 0, 1, 1], [], []>} : vector<2x40xbf16>, vector<40x128xbf16>, vector<2x128xf32> -> vector<2x128xf32>
    %c8 = arith.constant 8 : index
    %c0_73 = arith.constant 0 : index
    %159 = vector.load %arg5[%c8, %c0_73] : memref<9x160xf32, #tpu.memory_space<vmem>>, vector<1x128xf32>
    %160 = vector.broadcast %159 : vector<1x128xf32> to vector<2x128xf32>
    %161 = arith.addf %158, %160 : vector<2x128xf32>
    %162 = tpu.iota {dimensions = array<i32: 1>} : vector<2x128xi32>
    %c4_i32 = arith.constant 4 : i32
    %163 = vector.broadcast %c4_i32 : i32 to vector<2x128xi32>
    %164 = arith.cmpi slt, %162, %163 : vector<2x128xi32>
    %165 = math.tanh %161 : vector<2x128xf32>
    %166 = arith.select %164, %165, %161 : vector<2x128xi1>, vector<2x128xf32>
    %c0_74 = arith.constant 0 : index
    %c0_75 = arith.constant 0 : index
    %167 = vector.load %arg6[%c0_74, %c0_75] : memref<2x128xf32, #tpu.memory_space<vmem>>, vector<2x128xf32>
    tpu.vector_store %arg6[%c0_74, %c0_75], %166 {strides = array<i32>} : memref<2x128xf32, #tpu.memory_space<vmem>>, vector<2x128xf32>,
    return
  }
}

</mosaic_0001>

<bundles_post_ra>
// kernel: forward.1
= control target key start
LH: loop header
LB: loop body
LE: loop exit
PB: predicated region body
PF: predicated region fallthrough
CT: control target
= control target key end

     0   :  { %v4743_v0 = vmov 0   ;;  %vm209_vm0 = vcmask 523264   ;;  %vm4745_vm1 = vmmov 0   ;;  %vm3135_vm2 = vcmask 1043456   ;;  %s5759_s3 = inlined_call_operand.vmem [shape: bf16[2784,128], index: 3, kind: input, shape index: {}]   ;;  %s5760_s0 = inlined_call_operand.vmem [shape: bf16[128,192], index: 0, kind: input, shape index: {}]   ;;  %s5761_s2 = inlined_call_operand.vmem [shape: bf16[384,128], index: 2, kind: input, shape index: {}]   ;;  %s5762_s5 = inlined_call_operand.vmem [shape: f32[9,160], index: 5, kind: input, shape index: {}]   ;;  %s5763_s1 = inlined_call_operand.vmem [shape: f32[2,8], index: 1, kind: input, shape index: {}]   ;;  %s5764_s4 = inlined_call_operand.vmem [shape: bf16[80,160], index: 4, kind: input, shape index: {}]   ;;  %s5765_s6 = inlined_call_operand.vmem [shape: f32[2,128], index: 6, kind: output, shape index: {}]  }
   0x1   :  { %234 = vmatprep.subr.bf16.mxu0 %v4743_v0  ;;  %v4503_v1 = vld [vmem:[%s5759_s3] sm:$0xff]   ;;  %v4504_v2 = vld [vmem:[%s5759_s3 + $0x8] sm:$0xff]   ;;  %v4505_v3 = vld [vmem:[%s5759_s3 + $0x10] sm:$0xff]   ;;  %vm3131_vm3 = vcmask 64512   ;;  %vm3217_vm4 = vcmask 326656   ;;  %vm3443_vm5 = vcmask 261120  }
   0x2   :  { %235 = vmatpush1.bf16.msra.mxu0 %v4503_v1  ;;  %v4506_v4 = vld [vmem:[%s5759_s3 + $0x18] sm:$0xff]   ;;  %v4517_v5 = vld [vmem:[%s5760_s0 + $0x4] ss:$8 sps:$4 sm:$0xff]   ;;  %v4509_v8 = vld [vmem:[%s5759_s3 + $0x30] sm:$0xff]   ;;  %vm3530_vm6 = vcmask 654336  }
   0x3   :  { %236 = vmatprep.subr.bf16.mxu0 %v4743_v0  ;;  %v4507_v6 = vld [vmem:[%s5759_s3 + $0x20] sm:$0xff]   ;;  %3681 = vmatprep.mubr.msk.bf16.mxu0 %vm209_vm0, %v4517_v5  ;;  %v4508_v7 = vld [vmem:[%s5759_s3 + $0x28] sm:$0xff]   ;;  %v4510_v9 = vld [vmem:[%s5759_s3 + $0x38] sm:$0xff]  }
   0x4   :  { %v4511_v10 = vld [vmem:[%s5759_s3 + $0x40] sm:$0xff]   ;;  %v4512_v11 = vld [vmem:[%s5759_s3 + $0x48] sm:$0xff]   ;;  %v4513_v12 = vld [vmem:[%s5759_s3 + $0x50] sm:$0xff]  }
   0x5   :  { %v4514_v13 = vld [vmem:[%s5759_s3 + $0x58] sm:$0xff]   ;;  %v4515_v14 = vld [vmem:[%s5760_s0] ss:$8 sps:$4 sm:$0xff]   ;;  %v4521_v17 = vld [vmem:[%s5760_s0 + $0x24] ss:$8 sps:$4 sm:$0xff]  }
   0x6   :  { %237 = vmatpush1.bf16.msra.mxu0 %v4504_v2  ;;  %v4518_v15 = vld [vmem:[%s5760_s0 + $0x14] ss:$8 sps:$4 sm:$0xff]   ;;  %v4520_v16 = vld [vmem:[%s5760_s0 + $0x10] ss:$8 sps:$4 sm:$0xff]   ;;  %v4523_v18 = vld [vmem:[%s5760_s0 + $0x20] ss:$8 sps:$4 sm:$0xff]  }
   0x7   :  { %238 = vmatprep.subr.bf16.mxu0 %v4743_v0  ;;  %v4524_v19 = vld [vmem:[%s5760_s0 + $0x34] ss:$8 sps:$4 sm:$0xff]   ;;  %v4526_v20 = vld [vmem:[%s5760_s0 + $0x30] ss:$8 sps:$4 sm:$0xff]   ;;  %v4527_v21 = vld [vmem:[%s5760_s0 + $0x44] ss:$8 sps:$4 sm:$0xff]  }
   0x8   :  { %v4529_v22 = vld [vmem:[%s5760_s0 + $0x40] ss:$8 sps:$4 sm:$0xff]   ;;  %v4530_v23 = vld [vmem:[%s5760_s0 + $0x54] ss:$8 sps:$4 sm:$0xff]   ;;  %v4532_v24 = vld [vmem:[%s5760_s0 + $0x50] ss:$8 sps:$4 sm:$0xff]  }
   0x9   :  { %v4533_v25 = vld [vmem:[%s5760_s0 + $0x64] ss:$8 sps:$4 sm:$0xff]   ;;  %v4535_v26 = vld [vmem:[%s5760_s0 + $0x60] ss:$8 sps:$4 sm:$0xff]   ;;  %v4536_v27 = vld [vmem:[%s5760_s0 + $0x74] ss:$8 sps:$4 sm:$0xff]  }
   0xa   :  { %239 = vmatpush1.bf16.msra.mxu0 %v4505_v3  ;;  %v4538_v28 = vld [vmem:[%s5760_s0 + $0x70] ss:$8 sps:$4 sm:$0xff]   ;;  %v4539_v29 = vld [vmem:[%s5761_s2] sm:$0xff]  }
   0xb   :  { %240 = vmatprep.subr.bf16.mxu0 %v4743_v0  ;;  %4190 = vmatprep.mubr.bf16.mxu1 %v4539_v29  ;;  %v4891_v30 = vld [vmem:[%s5762_s5] ss:$0 sm:$0xff] }
   0xc   :  { %v4563_v3 = vld [vmem:[%s5759_s3 + $0xe0] sm:$0xff]  }
   0xe   :  { %241 = vmatpush1.bf16.msra.mxu0 %v4506_v4  ;;  %v4565_v4 = vld [vmem:[%s5759_s3 + $0xe8] sm:$0xff]  }
   0xf   :  { %242 = vmatprep.subr.bf16.mxu0 %v4743_v0 }
  0x12   :  { %243 = vmatpush1.bf16.msra.mxu0 %v4507_v6 }
  0x13   :  { %244 = vmatprep.subr.bf16.mxu0 %v4743_v0 }
  0x16   :  { %245 = vmatpush1.bf16.msra.mxu0 %v4508_v7 }
  0x17   :  { %246 = vmatprep.subr.bf16.mxu0 %v4743_v0 }
  0x1a   :  { %247 = vmatpush1.bf16.msra.mxu0 %v4509_v8 }
  0x1b   :  { %248 = vmatprep.subr.bf16.mxu0 %v4743_v0 }
  0x1e   :  { %249 = vmatpush1.bf16.msra.mxu0 %v4510_v9  ;;  %v4567_v9 = vld [vmem:[%s5759_s3 + $0xf0] sm:$0xff]  }
  0x1f   :  { %250 = vmatprep.subr.bf16.mxu0 %v4743_v0 }
  0x22   :  { %251 = vmatpush1.bf16.msra.mxu0 %v4511_v10 }
  0x23   :  { %252 = vmatprep.subr.bf16.mxu0 %v4743_v0 }
  0x26   :  { %253 = vmatpush1.bf16.msra.mxu0 %v4512_v11 }
  0x27   :  { %254 = vmatprep.subr.bf16.mxu0 %v4743_v0 }
  0x2a   :  { %255 = vmatpush1.bf16.msra.mxu0 %v4513_v12 }
  0x2b   :  { %256 = vmatprep.subr.bf16.mxu0 %v4743_v0 }
  0x2e   :  { %257 = vmatpush1.bf16.msra.mxu0 %v4514_v13 }
  0x2f   :  { %4238 = vmatprep.subr.bf16.mxu0 %v4563_v3 }
  0x31   :  { %267 = vmatmul.mubr.bf16.vlgmr.msra.gmra.mrb[0].mxu0 %v4515_v14 }
  0x32   :  { %3682 = vmatprep.mubr.msk.bf16.mxu0 %vm209_vm0, %v4518_v15  ;;  %4239 = vmatpush3.bf16.msra.mxu0 %v4563_v3  ;;  %v4561_v3 = vld [vmem:[%s5761_s2 + $0xb0] sm:$0xff]  }
  0x33   :  { %4240 = vmatprep.subr.bf16.mxu0 %v4565_v4 }
  0x36   :  { %4241 = vmatpush3.bf16.msra.mxu0 %v4565_v4  ;;  %v4562_v4 = vld [vmem:[%s5761_s2 + $0xb8] sm:$0xff]  }
  0x37   :  { %4242 = vmatprep.subr.bf16.mxu0 %v4567_v9 }
  0x39   :  { %275 = vmatmul.mubr.bf16.gmra.mrb[4].mxu0 %v4520_v16 }
  0x3a   :  { %3683 = vmatprep.mubr.msk.bf16.mxu0 %vm209_vm0, %v4521_v17  ;;  %4243 = vmatpush3.bf16.msra.mxu0 %v4567_v9  ;;  %v4573_v9 = vld [vmem:[%s5759_s3 + $0x120] sm:$0xff]  }
  0x41   :  { %283 = vmatmul.mubr.bf16.gmra.mrb[8].mxu0 %v4523_v18 }
  0x42   :  { %3684 = vmatprep.mubr.msk.bf16.mxu0 %vm209_vm0, %v4524_v19 }
  0x49   :  { %291 = vmatmul.mubr.bf16.gmra.mrb[12].mxu0 %v4526_v20 }
  0x4a   :  { %3685 = vmatprep.mubr.msk.bf16.mxu0 %vm209_vm0, %v4527_v21 }
  0x51   :  { %299 = vmatmul.mubr.bf16.gmra.mrb[16].mxu0 %v4529_v22 }
  0x52   :  { %3686 = vmatprep.mubr.msk.bf16.mxu0 %vm209_vm0, %v4530_v23 }
  0x59   :  { %307 = vmatmul.mubr.bf16.gmra.mrb[20].mxu0 %v4532_v24 }
  0x5a   :  { %3687 = vmatprep.mubr.msk.bf16.mxu0 %vm209_vm0, %v4533_v25 }
  0x61   :  { %315 = vmatmul.mubr.bf16.gmra.mrb[24].mxu0 %v4535_v26 }
  0x62   :  { %3688 = vmatprep.mubr.msk.bf16.mxu0 %vm209_vm0, %v4536_v27 }
  0x69   :  { %323 = vmatmul.mubr.bf16.gmra.mrb[28].mxu0 %v4538_v28 }
 0x104   :  { %v268_v31 = vpop.f32.mrb[0].mxu0 }
 0x105   :  { %v269_v32 = vadd.f32 %v268_v31, %v4891_v30  ;;  %v270_v33 = vpop.f32.mrb[1].mxu0 }
 0x106   :  { %v271_v34 = vpop.f32.mrb[2].mxu0 }
 0x107   :  { %v272_v35 = vadd.f32 %v271_v34, %v4891_v30  ;;  %v273_v36 = vpop.f32.mrb[3].mxu0  ;;  %v331_v37 = vmax.f32 %v269_v32, 0.0 }
 0x109   :  { %v332_v38 = vmax.f32 %v272_v35, 0.0 }
 0x10b   :  { %v395_v39 = vpack.c.bf16 %v332_v38, %v331_v37 }
 0x10c   :  { %v276_v40 = vpop.f32.mrb[4].mxu0 }
 0x10d   :  { %v277_v41 = vadd.f32 %v276_v40, %v4891_v30  ;;  %v278_v42 = vpop.f32.mrb[5].mxu0  ;;  %4174 = vmatprep.subr.bf16.mxu1 %v395_v39 }
 0x10e   :  { %v279_v43 = vpop.f32.mrb[6].mxu0  ;;  %4175 = vmatpush3.bf16.msra.mxu1 %v395_v39 }
 0x10f   :  { %v280_v44 = vadd.f32 %v279_v43, %v4891_v30  ;;  %v281_v45 = vpop.f32.mrb[7].mxu0  ;;  %v333_v46 = vmax.f32 %v277_v41, 0.0 }
 0x110   :  { %v4540_v45 = vld [vmem:[%s5761_s2 + $0x8] sm:$0xff]  }
 0x111   :  { %v334_v47 = vmax.f32 %v280_v44, 0.0  ;;  %v4564_v44 = vld [vmem:[%s5759_s3 + $0x100] sm:$0xff]  }
 0x113   :  { %v396_v48 = vpack.c.bf16 %v334_v47, %v333_v46  ;;  %v4541_v46 = vld [vmem:[%s5761_s2 + $0x10] sm:$0xff]   ;;  %v4542_v47 = vld [vmem:[%s5761_s2 + $0x18] sm:$0xff]  }
 0x114   :  { %v284_v49 = vpop.f32.mrb[8].mxu0 }
 0x115   :  { %v285_v50 = vadd.f32 %v284_v49, %v4891_v30  ;;  %v286_v51 = vpop.f32.mrb[9].mxu0  ;;  %4176 = vmatprep.subr.bf16.mxu1 %v396_v48  ;;  %v4544_v49 = vld [vmem:[%s5761_s2 + $0x28] sm:$0xff]  }
 0x116   :  { %v287_v52 = vpop.f32.mrb[10].mxu0  ;;  %4177 = vmatpush3.bf16.msra.mxu1 %v396_v48  ;;  %v4543_v48 = vld [vmem:[%s5761_s2 + $0x20] sm:$0xff]   ;;  %v4546_v51 = vld [vmem:[%s5761_s2 + $0x38] sm:$0xff]  }
 0x117   :  { %v288_v53 = vadd.f32 %v287_v52, %v4891_v30  ;;  %v289_v54 = vpop.f32.mrb[11].mxu0  ;;  %v335_v55 = vmax.f32 %v285_v50, 0.0  ;;  %v4545_v50 = vld [vmem:[%s5761_s2 + $0x30] sm:$0xff]   ;;  %v4547_v52 = vld [vmem:[%s5761_s2 + $0x40] sm:$0xff]  }
 0x118   :  { %v4549_v54 = vld [vmem:[%s5761_s2 + $0x50] sm:$0xff]  }
 0x119   :  { %v336_v56 = vmax.f32 %v288_v53, 0.0  ;;  %v4548_v53 = vld [vmem:[%s5761_s2 + $0x48] sm:$0xff]  }
 0x11b   :  { %v397_v57 = vpack.c.bf16 %v336_v56, %v335_v55  ;;  %v4550_v55 = vld [vmem:[%s5761_s2 + $0x58] sm:$0xff]   ;;  %v4551_v56 = vld [vmem:[%s5761_s2 + $0x60] sm:$0xff]  }
 0x11c   :  { %v292_v58 = vpop.f32.mrb[12].mxu0 }
 0x11d   :  { %v293_v59 = vadd.f32 %v292_v58, %v4891_v30  ;;  %v294_v60 = vpop.f32.mrb[13].mxu0  ;;  %4178 = vmatprep.subr.bf16.mxu1 %v397_v57  ;;  %v4553_v58 = vld [vmem:[%s5761_s2 + $0x70] sm:$0xff]  }
 0x11e   :  { %v295_v61 = vpop.f32.mrb[14].mxu0  ;;  %4179 = vmatpush3.bf16.msra.mxu1 %v397_v57  ;;  %v4552_v57 = vld [vmem:[%s5761_s2 + $0x68] sm:$0xff]   ;;  %v4555_v60 = vld [vmem:[%s5761_s2 + $0x80] sm:$0xff]  }
 0x11f   :  { %v296_v62 = vadd.f32 %v295_v61, %v4891_v30  ;;  %v297_v63 = vpop.f32.mrb[15].mxu0  ;;  %v337_v1 = vmax.f32 %v293_v59, 0.0  ;;  %v4554_v59 = vld [vmem:[%s5761_s2 + $0x78] sm:$0xff]   ;;  %v4556_v61 = vld [vmem:[%s5761_s2 + $0x88] sm:$0xff]  }
 0x120   :  { %v4558_v63 = vld [vmem:[%s5761_s2 + $0x98] sm:$0xff]  }
 0x121   :  { %v338_v2 = vmax.f32 %v296_v62, 0.0  ;;  %v4557_v62 = vld [vmem:[%s5761_s2 + $0x90] sm:$0xff]  }
 0x123   :  { %v398_v5 = vpack.c.bf16 %v338_v2, %v337_v1  ;;  %v4559_v1 = vld [vmem:[%s5761_s2 + $0xa0] sm:$0xff]   ;;  %v4560_v2 = vld [vmem:[%s5761_s2 + $0xa8] sm:$0xff]  }
 0x124   :  { %v300_v6 = vpop.f32.mrb[16].mxu0 }
 0x125   :  { %v301_v7 = vadd.f32 %v300_v6, %v4891_v30  ;;  %v302_v8 = vpop.f32.mrb[17].mxu0  ;;  %4180 = vmatprep.subr.bf16.mxu1 %v398_v5  ;;  %v4569_v6 = vld [vmem:[%s5759_s3 + $0x110] sm:$0xff]  }
 0x126   :  { %v303_v10 = vpop.f32.mrb[18].mxu0  ;;  %4181 = vmatpush3.bf16.msra.mxu1 %v398_v5  ;;  %v4568_v5 = vld [vmem:[%s5759_s3 + $0xf8] sm:$0xff]  }
 0x127   :  { %v304_v11 = vadd.f32 %v303_v10, %v4891_v30  ;;  %v305_v12 = vpop.f32.mrb[19].mxu0  ;;  %v339_v13 = vmax.f32 %v301_v7, 0.0  ;;  %4244 = vmatprep.subr.bf16.mxu0 %v4568_v5  ;;  %v4570_v7 = vld [vmem:[%s5759_s3 + $0x60] sm:$0xff]   ;;  %v4571_v8 = vld [vmem:[%s5759_s3 + $0x118] sm:$0xff]  }
 0x128   :  { %4245 = vmatpush3.bf16.msra.mxu0 %v4568_v5 }
 0x129   :  { %v340_v14 = vmax.f32 %v304_v11, 0.0  ;;  %4250 = vmatprep.subr.bf16.mxu0 %v4570_v7 }
 0x12b   :  { %v399_v15 = vpack.c.bf16 %v340_v14, %v339_v13 }
 0x12c   :  { %v308_v16 = vpop.f32.mrb[20].mxu0 }
 0x12d   :  { %v309_v17 = vadd.f32 %v308_v16, %v4891_v30  ;;  %v310_v18 = vpop.f32.mrb[21].mxu0  ;;  %4182 = vmatprep.subr.bf16.mxu1 %v399_v15 }
 0x12e   :  { %v311_v19 = vpop.f32.mrb[22].mxu0  ;;  %4183 = vmatpush3.bf16.msra.mxu1 %v399_v15 }
 0x12f   :  { %v312_v20 = vadd.f32 %v311_v19, %v4891_v30  ;;  %v313_v21 = vpop.f32.mrb[23].mxu0  ;;  %v341_v22 = vmax.f32 %v309_v17, 0.0 }
 0x131   :  { %v342_v23 = vmax.f32 %v312_v20, 0.0 }
 0x133   :  { %v400_v24 = vpack.c.bf16 %v342_v23, %v341_v22 }
 0x134   :  { %v316_v25 = vpop.f32.mrb[24].mxu0 }
 0x135   :  { %v317_v26 = vadd.f32 %v316_v25, %v4891_v30  ;;  %v318_v27 = vpop.f32.mrb[25].mxu0  ;;  %4184 = vmatprep.subr.bf16.mxu1 %v400_v24 }
 0x136   :  { %v319_v28 = vpop.f32.mrb[26].mxu0  ;;  %4185 = vmatpush3.bf16.msra.mxu1 %v400_v24 }
 0x137   :  { %v320_v29 = vadd.f32 %v319_v28, %v4891_v30  ;;  %v321_v31 = vpop.f32.mrb[27].mxu0  ;;  %v343_v32 = vmax.f32 %v317_v26, 0.0 }
 0x139   :  { %v344_v33 = vmax.f32 %v320_v29, 0.0 }
 0x13b   :  { %v401_v34 = vpack.c.bf16 %v344_v33, %v343_v32  ;;  %v4572_v33 = vld [vmem:[%s5759_s3 + $0x68] sm:$0xff]  }
 0x13c   :  { %v324_v35 = vpop.f32.mrb[28].mxu0 }
 0x13d   :  { %v325_v36 = vadd.f32 %v324_v35, %v4891_v30  ;;  %v326_v37 = vpop.f32.mrb[29].mxu0  ;;  %4186 = vmatprep.subr.bf16.mxu1 %v401_v34 }
 0x13e   :  { %v327_v38 = vpop.f32.mrb[30].mxu0  ;;  %4187 = vmatpush3.bf16.msra.mxu1 %v401_v34 }
 0x13f   :  { %v328_v39 = vadd.f32 %v327_v38, %v4891_v30  ;;  %v329_v40 = vpop.f32.mrb[31].mxu0  ;;  %v345_v41 = vmax.f32 %v325_v36, 0.0  ;;  %v4566_v30 = vld [vmem:[%s5759_s3 + $0x108] sm:$0xff]   ;;  %v4574_v36 = vld [vmem:[%s5759_s3 + $0x70] sm:$0xff]  }
 0x141   :  { %v346_v42 = vmax.f32 %v328_v39, 0.0 }
 0x143   :  { %v402_v43 = vpack.c.bf16 %v346_v42, %v345_v41  ;;  %v4575_v42 = vld [vmem:[%s5759_s3 + $0x128] sm:$0xff]  }
 0x145   :  { %4188 = vmatprep.subr.bf16.mxu1 %v402_v43 }
 0x146   :  { %4189 = vmatpush3.bf16.msra.mxu1 %v402_v43  ;;  %v4576_v43 = vld [vmem:[%s5759_s3 + $0x78] sm:$0xff]  }
 0x147   :  { %4262 = vmatprep.subr.bf16.mxu1 %v4564_v44 }
 0x149   :  { %4191 = vmatmul.mubr.bf16.vlgmr.msra.gmra.mrb[0].mxu1 %v4540_v45 }
 0x14a   :  { %4194 = vmatprep.mubr.bf16.mxu1 %v4541_v46  ;;  %4263 = vmatpush3.bf16.msra.mxu1 %v4564_v44  ;;  %v4577_v44 = vld [vmem:[%s5759_s3 + $0x130] sm:$0xff]   ;;  %v4578_v46 = vld [vmem:[%s5759_s3 + $0x80] sm:$0xff]  }
 0x14b   :  { %4264 = vmatprep.subr.bf16.mxu1 %v4566_v30 }
 0x14e   :  { %4265 = vmatpush3.bf16.msra.mxu1 %v4566_v30 }
 0x14f   :  { %4266 = vmatprep.subr.bf16.mxu1 %v4569_v6 }
 0x151   :  { %4195 = vmatmul.mubr.bf16.gmra.mrb[4].mxu1 %v4542_v47 }
 0x152   :  { %4198 = vmatprep.mubr.bf16.mxu1 %v4543_v48  ;;  %4267 = vmatpush3.bf16.msra.mxu1 %v4569_v6 }
 0x153   :  { %4268 = vmatprep.subr.bf16.mxu1 %v4571_v8 }
 0x156   :  { %4269 = vmatpush3.bf16.msra.mxu1 %v4571_v8 }
 0x157   :  { %4286 = vmatprep.subr.bf16.mxu1 %v4573_v9 }
 0x159   :  { %4199 = vmatmul.mubr.bf16.gmra.mrb[8].mxu1 %v4544_v49 }
 0x15a   :  { %4202 = vmatprep.mubr.bf16.mxu1 %v4545_v50 }
 0x161   :  { %4203 = vmatmul.mubr.bf16.gmra.mrb[12].mxu1 %v4546_v51  ;;  %v4579_v51 = vld [vmem:[%s5759_s3 + $0x138] sm:$0xff]  }
 0x162   :  { %4206 = vmatprep.mubr.bf16.mxu1 %v4547_v52  ;;  %v4580_v52 = vld [vmem:[%s5759_s3 + $0x88] sm:$0xff]  }
 0x169   :  { %4207 = vmatmul.mubr.bf16.gmra.mrb[16].mxu1 %v4548_v53  ;;  %v4581_v53 = vld [vmem:[%s5759_s3 + $0x140] sm:$0xff]  }
 0x16a   :  { %4210 = vmatprep.mubr.bf16.mxu1 %v4549_v54 }
 0x171   :  { %4211 = vmatmul.mubr.bf16.gmra.mrb[20].mxu1 %v4550_v55  ;;  %v4582_v55 = vld [vmem:[%s5759_s3 + $0x90] sm:$0xff]  }
 0x172   :  { %4214 = vmatprep.mubr.bf16.mxu1 %v4551_v56 }
 0x179   :  { %4215 = vmatmul.mubr.bf16.gmra.mrb[24].mxu1 %v4552_v57 }
 0x17a   :  { %4218 = vmatprep.mubr.bf16.mxu1 %v4553_v58 }
 0x181   :  { %4219 = vmatmul.mubr.bf16.gmra.mrb[28].mxu1 %v4554_v59 }
 0x182   :  { %4222 = vmatprep.mubr.bf16.mxu1 %v4555_v60  ;;  %v4583_v60 = vld [vmem:[%s5759_s3 + $0x148] sm:$0xff]  }
 0x189   :  { %4223 = vmatmul.mubr.bf16.gmra.mrb[32].mxu1 %v4556_v61 }
 0x18a   :  { %4226 = vmatprep.mubr.bf16.mxu1 %v4557_v62  ;;  %v4584_v62 = vld [vmem:[%s5759_s3 + $0x98] sm:$0xff]  }
 0x191   :  { %4227 = vmatmul.mubr.bf16.gmra.mrb[36].mxu1 %v4558_v63  ;;  %v4585_v63 = vld [vmem:[%s5759_s3 + $0x150] sm:$0xff]  }
 0x192   :  { %4230 = vmatprep.mubr.bf16.mxu1 %v4559_v1 }
 0x199   :  { %4231 = vmatmul.mubr.bf16.gmra.mrb[40].mxu1 %v4560_v2  ;;  %v4586_v2 = vld [vmem:[%s5759_s3 + $0xa0] sm:$0xff]  }
 0x19a   :  { %4234 = vmatprep.mubr.bf16.mxu1 %v4561_v3 }
 0x1a1   :  { %4235 = vmatmul.mubr.bf16.gmra.mrb[44].mxu1 %v4562_v4 }
 0x21c   :  { %v4192_v10 = vpop.f32.mrb[0].mxu1 }
 0x21d   :  { %v581_v11 = vpop.f32.mrb[1].mxu1  ;;  %v781_v50 = vpack.c.bf16 %v4192_v10, %v4192_v10  ;;  %v4588_v10 = vld [vmem:[%s5759_s3 + $0xa8] sm:$0xff]  }
 0x21e   :  { %v5008_v12 = vpop.f32.mrb[2].mxu1 }
 0x21f   :  { %v584_v13 = vpop.f32.mrb[3].mxu1 }
 0x220   :  { %v780_v14 = vpack.c.bf16 %v584_v13, %v581_v11  ;;  %v4589_v11 = vld [vmem:[%s5759_s3 + $0x160] sm:$0xff]   ;;  %v4590_v13 = vld [vmem:[%s5759_s3 + $0xb0] sm:$0xff]  }
 0x224   :  { %v5010_v15 = vpop.f32.mrb[4].mxu1 }
 0x225   :  { %v597_v16 = vpop.f32.mrb[5].mxu1 }
 0x226   :  { %v790_v17 = vpack.c.bf16 %v597_v16, %v5008_v12  ;;  %v5013_v18 = vpop.f32.mrb[6].mxu1 }
 0x227   :  { %v800_v19 = vpack.c.bf16 %v5013_v18, %v5010_v15  ;;  %v5017_v20 = vpop.f32.mrb[7].mxu1  ;;  %v4591_v18 = vld [vmem:[%s5759_s3 + $0x168] sm:$0xff]  }
 0x228   :  { %v791_v8 = vpack.c.bf16 %v5017_v20, %v5017_v20  ;;  %v4592_v20 = vld [vmem:[%s5759_s3 + $0xb8] sm:$0xff]  }
 0x22c   :  { %v5019_v21 = vpop.f32.mrb[8].mxu1 }
 0x22d   :  { %v5021_v22 = vpop.f32.mrb[9].mxu1 }
 0x22e   :  { %v5023_v23 = vpop.f32.mrb[10].mxu1 }
 0x22f   :  { %v5025_v24 = vpop.f32.mrb[11].mxu1 }
 0x230   :  { %v810_v25 = vpack.c.bf16 %v5019_v21, %v5025_v24 }
 0x234   :  { %v4204_v26 = vpop.f32.mrb[12].mxu1 }
 0x235   :  { %v629_v27 = vpop.f32.mrb[13].mxu1  ;;  %v821_v32 = vpack.c.bf16 %v4204_v26, %v4204_v26  ;;  %v4593_v26 = vld [vmem:[%s5759_s3 + $0x170] sm:$0xff]  }
 0x236   :  { %v4205_v28 = vpop.f32.mrb[14].mxu1 }
 0x237   :  { %v632_v29 = vpop.f32.mrb[15].mxu1 }
 0x238   :  { %v820_v31 = vpack.c.bf16 %v632_v29, %v629_v27 }
 0x23a   :  { %4246 = vmatprep.mubr.msk.bf16.mxu0 %vm209_vm0, %v820_v31 }
 0x23b   :  { %4247 = vmatmul.mubr.msk.bf16.vlgmr.msra.gmra.mrb[32].mxu0 %vm209_vm0, %v821_v32 }
 0x23c   :  { %4251 = vmatpush3.bf16.msra.mxu0 %v4570_v7  ;;  %v4208_v34 = vpop.f32.mrb[16].mxu1  ;;  %4258 = vmatprep.mubr.msk.bf16.mxu0 %vm209_vm0, %v780_v14 }
 0x23d   :  { %v645_v35 = vpop.f32.mrb[17].mxu1  ;;  %4252 = vmatprep.subr.bf16.mxu0 %v4572_v33 }
 0x23e   :  { %v986_v37 = vpack.c.bf16 %v645_v35, %v4205_v28  ;;  %v4209_v38 = vpop.f32.mrb[18].mxu1  ;;  %v4594_v28 = vld [vmem:[%s5759_s3 + $0xc0] sm:$0xff]   ;;  %v4595_v35 = vld [vmem:[%s5759_s3 + $0x178] sm:$0xff]  }
 0x23f   :  { %v1152_v39 = vpack.c.bf16 %v4209_v38, %v4208_v34  ;;  %v648_v40 = vpop.f32.mrb[19].mxu1  ;;  %v801_v34 = vpack.c.bf16 %v5021_v22, %v5021_v22  ;;  %v4597_v22 = vld [vmem:[%s5759_s3 + $0x1a0] sm:$0xff]   ;;  %v4598_v38 = vld [vmem:[%s5759_s3 + $0xd0] sm:$0xff]  }
 0x240   :  { %v987_v41 = vpack.c.bf16 %v648_v40, %v648_v40  ;;  %4253 = vmatpush3.bf16.msra.mxu0 %v4572_v33  ;;  %4270 = vmatprep.mubr.msk.bf16.mxu1 %vm209_vm0, %v986_v37 }
 0x241   :  { %4254 = vmatprep.subr.bf16.mxu0 %v4574_v36 }
 0x242   :  { %4271 = vmatmul.mubr.msk.bf16.vlgmr.msra.gmra.mrb[48].mxu1 %vm209_vm0, %v987_v41 }
 0x243   :  { %4287 = vmatpush3.bf16.msra.mxu1 %v4573_v9  ;;  %4294 = vmatprep.mubr.msk.bf16.mxu1 %vm209_vm0, %v1152_v39  ;;  %v4587_v9 = vld [vmem:[%s5759_s3 + $0x158] sm:$0xff]  }
 0x244   :  { %4255 = vmatpush3.bf16.msra.mxu0 %v4574_v36  ;;  %4288 = vmatprep.subr.bf16.mxu1 %v4575_v42  ;;  %v4212_v45 = vpop.f32.mrb[20].mxu1  ;;  %v4596_v36 = vld [vmem:[%s5759_s3 + $0xc8] sm:$0xff]  }
 0x245   :  { %4256 = vmatprep.subr.bf16.mxu0 %v4576_v43  ;;  %v661_v30 = vpop.f32.mrb[21].mxu1 }
 0x246   :  { %v5053_v47 = vpop.f32.mrb[22].mxu1  ;;  %v1153_v57 = vpack.c.bf16 %v661_v30, %v661_v30 }
 0x247   :  { %4289 = vmatpush3.bf16.msra.mxu1 %v4575_v42  ;;  %v664_v48 = vpop.f32.mrb[23].mxu1  ;;  %v1319_v16 = vpack.c.bf16 %v5053_v47, %v5053_v47  ;;  %v4599_v42 = vld [vmem:[%s5759_s3 + $0x1a8] sm:$0xff]  }
 0x248   :  { %4257 = vmatpush3.bf16.msra.mxu0 %v4576_v43  ;;  %4290 = vmatprep.subr.bf16.mxu1 %v4577_v44  ;;  %v1318_v49 = vpack.c.bf16 %v4212_v45, %v664_v48  ;;  %v4600_v43 = vld [vmem:[%s5759_s3 + $0xd8] sm:$0xff]  }
 0x249   :  { %4274 = vmatprep.subr.bf16.mxu0 %v4578_v46 }
 0x24b   :  { %4259 = vmatmul.mubr.msk.bf16.vlgmr.msra.gmra.mrb[36].mxu0 %vm209_vm0, %v781_v50  ;;  %4291 = vmatpush3.bf16.msra.mxu1 %v4577_v44  ;;  %v4601_v44 = vld [vmem:[%s5759_s3 + $0x1b0] sm:$0xff]  }
 0x24c   :  { %4275 = vmatpush3.bf16.msra.mxu0 %v4578_v46  ;;  %4282 = vmatprep.mubr.msk.bf16.mxu0 %vm209_vm0, %v790_v17  ;;  %v5066_v54 = vpop.f32.mrb[24].mxu1  ;;  %v4602_v46 = vld [vmem:[%s5759_s3 + $0x180] sm:$0xff]  }
 0x24d   :  { %4292 = vmatprep.subr.bf16.mxu1 %v4579_v51  ;;  %4276 = vmatprep.subr.bf16.mxu0 %v4580_v52  ;;  %v677_v56 = vpop.f32.mrb[25].mxu1  ;;  %v1485_v40 = vpack.c.bf16 %v5066_v54, %v5066_v54 }
 0x24e   :  { %v5071_v58 = vpop.f32.mrb[26].mxu1 }
 0x24f   :  { %4293 = vmatpush3.bf16.msra.mxu1 %v4579_v51  ;;  %v680_v59 = vpop.f32.mrb[27].mxu1  ;;  %v811_v51 = vpack.c.bf16 %v5023_v23, %v5023_v23  ;;  %v4606_v23 = vld [vmem:[%s5759_s3 + $0x190] sm:$0xff]  }
 0x250   :  { %4277 = vmatpush3.bf16.msra.mxu0 %v4580_v52  ;;  %4310 = vmatprep.subr.bf16.mxu1 %v4581_v53  ;;  %v1484_v61 = vpack.c.bf16 %v680_v59, %v677_v56  ;;  %v4604_v52 = vld [vmem:[%s5759_s3 + $0x188] sm:$0xff]   ;;  %v4608_v56 = vld [vmem:[%s5759_s3 + $0x198] sm:$0xff]  }
 0x251   :  { %4278 = vmatprep.subr.bf16.mxu0 %v4582_v55  ;;  %v4611_v59 = vld [vmem:[%s5759_s3 + $0x1f8] sm:$0xff]  }
 0x252   :  { %4295 = vmatmul.mubr.msk.bf16.vlgmr.msra.gmra.mrb[52].mxu1 %vm209_vm0, %v1153_v57  ;;  %v4609_v57 = vld [vmem:[%s5759_s3 + $0x1f0] sm:$0xff]  }
 0x253   :  { %4311 = vmatpush3.bf16.msra.mxu1 %v4581_v53  ;;  %4318 = vmatprep.mubr.msk.bf16.mxu1 %vm209_vm0, %v1318_v49  ;;  %v4603_v49 = vld [vmem:[%s5759_s3 + $0x1b8] sm:$0xff]   ;;  %v4605_v53 = vld [vmem:[%s5759_s3 + $0x1e0] sm:$0xff]  }
 0x254   :  { %4279 = vmatpush3.bf16.msra.mxu0 %v4582_v55  ;;  %4312 = vmatprep.subr.bf16.mxu1 %v4583_v60  ;;  %v5084_v1 = vpop.f32.mrb[28].mxu1  ;;  %v4607_v55 = vld [vmem:[%s5759_s3 + $0x1e8] sm:$0xff]  }
 0x255   :  { %4280 = vmatprep.subr.bf16.mxu0 %v4584_v62  ;;  %v5089_v3 = vpop.f32.mrb[29].mxu1 }
 0x256   :  { %v1575_v4 = vpack.c.bf16 %v5089_v3, %v5071_v58  ;;  %v5093_v5 = vpop.f32.mrb[30].mxu1  ;;  %v4610_v58 = vld [vmem:[%s5759_s3 + $0x1c0] sm:$0xff]   ;;  %v4616_v3 = vld [vmem:[%s5759_s3 + $0x1d8] sm:$0xff]  }
 0x257   :  { %4313 = vmatpush3.bf16.msra.mxu1 %v4583_v60  ;;  %v1666_v6 = vpack.c.bf16 %v5093_v5, %v5084_v1  ;;  %v5097_v7 = vpop.f32.mrb[31].mxu1  ;;  %v4618_v5 = vld [vmem:[%s5759_s3 + $0x200] sm:$0xff]  }
 0x258   :  { %4281 = vmatpush3.bf16.msra.mxu0 %v4584_v62  ;;  %4314 = vmatprep.subr.bf16.mxu1 %v4585_v63  ;;  %v1576_v60 = vpack.c.bf16 %v5097_v7, %v5097_v7  ;;  %v4613_v62 = vld [vmem:[%s5759_s3 + $0x220] sm:$0xff]  }
 0x259   :  { %4298 = vmatprep.subr.bf16.mxu0 %v4586_v2 }
 0x25b   :  { %4283 = vmatmul.mubr.msk.bf16.vlgmr.msra.gmra.mrb[40].mxu0 %vm209_vm0, %v791_v8  ;;  %4315 = vmatpush3.bf16.msra.mxu1 %v4585_v63  ;;  %v4614_v63 = vld [vmem:[%s5759_s3 + $0x1d0] sm:$0xff]   ;;  %v4620_v8 = vld [vmem:[%s5759_s3 + $0x208] sm:$0xff]  }
 0x25c   :  { %4299 = vmatpush3.bf16.msra.mxu0 %v4586_v2  ;;  %4306 = vmatprep.mubr.msk.bf16.mxu0 %vm209_vm0, %v800_v19  ;;  %v5115_v12 = vpop.f32.mrb[32].mxu1  ;;  %v4615_v2 = vld [vmem:[%s5759_s3 + $0x228] sm:$0xff]  }
 0x25d   :  { %4316 = vmatprep.subr.bf16.mxu1 %v4587_v9  ;;  %4300 = vmatprep.subr.bf16.mxu0 %v4588_v10  ;;  %v5120_v14 = vpop.f32.mrb[33].mxu1 }
 0x25e   :  { %v5124_v15 = vpop.f32.mrb[34].mxu1  ;;  %v1667_v54 = vpack.c.bf16 %v5120_v14, %v5120_v14  ;;  %v4624_v14 = vld [vmem:[%s5759_s3 + $0x248] sm:$0xff]  }
 0x25f   :  { %4317 = vmatpush3.bf16.msra.mxu1 %v4587_v9  ;;  %v5126_v17 = vpop.f32.mrb[35].mxu1  ;;  %v1758_v7 = vpack.c.bf16 %v5124_v15, %v5124_v15  ;;  %v4621_v9 = vld [vmem:[%s5759_s3 + $0x210] sm:$0xff]   ;;  %v4626_v15 = vld [vmem:[%s5759_s3 + $0x258] sm:$0xff]  }
 0x260   :  { %4301 = vmatpush3.bf16.msra.mxu0 %v4588_v10  ;;  %4334 = vmatprep.subr.bf16.mxu1 %v4589_v11  ;;  %v1757_v19 = vpack.c.bf16 %v5115_v12, %v5126_v17  ;;  %v4623_v12 = vld [vmem:[%s5759_s3 + $0x240] sm:$0xff]  }
 0x261   :  { %4302 = vmatprep.subr.bf16.mxu0 %v4590_v13 }
 0x262   :  { %4319 = vmatmul.mubr.msk.bf16.vlgmr.msra.gmra.mrb[56].mxu1 %vm209_vm0, %v1319_v16  ;;  %v4625_v16 = vld [vmem:[%s5759_s3 + $0x250] sm:$0xff]  }
 0x263   :  { %4335 = vmatpush3.bf16.msra.mxu1 %v4589_v11  ;;  %4342 = vmatprep.mubr.msk.bf16.mxu1 %vm209_vm0, %v1484_v61  ;;  %v4612_v61 = vld [vmem:[%s5759_s3 + $0x1c8] sm:$0xff]   ;;  %v4622_v11 = vld [vmem:[%s5759_s3 + $0x218] sm:$0xff]  }
 0x264   :  { %4303 = vmatpush3.bf16.msra.mxu0 %v4590_v13  ;;  %4336 = vmatprep.subr.bf16.mxu1 %v4591_v18  ;;  %v5141_v27 = vpop.f32.mrb[36].mxu1 }
 0x265   :  { %4304 = vmatprep.subr.bf16.mxu0 %v4592_v20  ;;  %v5146_v29 = vpop.f32.mrb[37].mxu1  ;;  %v1849_v1 = vpack.c.bf16 %v5141_v27, %v5141_v27  ;;  %v4631_v27 = vld [vmem:[%s5759_s3 + $0x2a8] sm:$0xff]  }
 0x266   :  { %v5148_v31 = vpop.f32.mrb[38].mxu1 }
 0x267   :  { %4337 = vmatpush3.bf16.msra.mxu1 %v4591_v18  ;;  %v5150_v32 = vpop.f32.mrb[39].mxu1  ;;  %v4627_v18 = vld [vmem:[%s5759_s3 + $0x2a0] sm:$0xff]  }
 0x268   :  { %4305 = vmatpush3.bf16.msra.mxu0 %v4592_v20  ;;  %4338 = vmatprep.subr.bf16.mxu1 %v4593_v26  ;;  %v1848_v33 = vpack.c.bf16 %v5150_v32, %v5146_v29  ;;  %v4629_v20 = vld [vmem:[%s5759_s3 + $0x260] sm:$0xff]   ;;  %v4633_v29 = vld [vmem:[%s5759_s3 + $0x268] sm:$0xff]   ;;  %v4635_v32 = vld [vmem:[%s5759_s3 + $0x2b0] sm:$0xff]  }
 0x269   :  { %4322 = vmatprep.subr.bf16.mxu0 %v4594_v28 }
 0x26b   :  { %4307 = vmatmul.mubr.msk.bf16.vlgmr.msra.gmra.mrb[44].mxu0 %vm209_vm0, %v801_v34  ;;  %4339 = vmatpush3.bf16.msra.mxu1 %v4593_v26  ;;  %v4630_v26 = vld [vmem:[%s5759_s3 + $0x2e0] sm:$0xff]   ;;  %v4637_v34 = vld [vmem:[%s5759_s3 + $0x270] sm:$0xff]  }
 0x26c   :  { %4323 = vmatpush3.bf16.msra.mxu0 %v4594_v28  ;;  %4330 = vmatprep.mubr.msk.bf16.mxu0 %vm209_vm0, %v810_v25  ;;  %v5170_v37 = vpop.f32.mrb[40].mxu1  ;;  %v4632_v28 = vld [vmem:[%s5759_s3 + $0x328] sm:$0xff]  }
 0x26d   :  { %4340 = vmatprep.subr.bf16.mxu1 %v4595_v35  ;;  %4324 = vmatprep.subr.bf16.mxu0 %v4596_v36  ;;  %v5175_v39 = vpop.f32.mrb[41].mxu1 }
 0x26e   :  { %v1939_v21 = vpack.c.bf16 %v5175_v39, %v5148_v31  ;;  %v5181_v24 = vpop.f32.mrb[42].mxu1  ;;  %v4634_v31 = vld [vmem:[%s5759_s3 + $0x2e8] sm:$0xff]   ;;  %v4643_v39 = vld [vmem:[%s5759_s3 + $0x2c0] sm:$0xff]  }
 0x26f   :  { %4341 = vmatpush3.bf16.msra.mxu1 %v4595_v35  ;;  %v2030_v25 = vpack.c.bf16 %v5181_v24, %v5170_v37  ;;  %v5185_v41 = vpop.f32.mrb[43].mxu1  ;;  %v4638_v35 = vld [vmem:[%s5759_s3 + $0x2f0] sm:$0xff]   ;;  %v4641_v37 = vld [vmem:[%s5759_s3 + $0x278] sm:$0xff]   ;;  %v4646_v24 = vld [vmem:[%s5759_s3 + $0x300] sm:$0xff]  }
 0x270   :  { %4325 = vmatpush3.bf16.msra.mxu0 %v4596_v36  ;;  %4358 = vmatprep.subr.bf16.mxu1 %v4597_v22  ;;  %v1940_v13 = vpack.c.bf16 %v5185_v41, %v5185_v41  ;;  %v4639_v36 = vld [vmem:[%s5759_s3 + $0x2b8] sm:$0xff]  }
 0x271   :  { %4326 = vmatprep.subr.bf16.mxu0 %v4598_v38 }
 0x272   :  { %4343 = vmatmul.mubr.msk.bf16.vlgmr.msra.gmra.mrb[60].mxu1 %vm209_vm0, %v1485_v40  ;;  %v4644_v40 = vld [vmem:[%s5759_s3 + $0x340] sm:$0xff]  }
 0x273   :  { %4359 = vmatpush3.bf16.msra.mxu1 %v4597_v22  ;;  %4366 = vmatprep.mubr.msk.bf16.mxu1 %vm209_vm0, %v1666_v6  ;;  %v4619_v6 = vld [vmem:[%s5759_s3 + $0x238] sm:$0xff]  }
 0x274   :  { %4327 = vmatpush3.bf16.msra.mxu0 %v4598_v38  ;;  %4360 = vmatprep.subr.bf16.mxu1 %v4599_v42  ;;  %v5201_v45 = vpop.f32.mrb[44].mxu1  ;;  %v4640_v22 = vld [vmem:[%s5759_s3 + $0x338] sm:$0xff]  }
 0x275   :  { %4328 = vmatprep.subr.bf16.mxu0 %v4600_v43  ;;  %v5206_v30 = vpop.f32.mrb[45].mxu1  ;;  %v4642_v38 = vld [vmem:[%s5759_s3 + $0x2f8] sm:$0xff]  }
 0x276   :  { %v5208_v47 = vpop.f32.mrb[46].mxu1  ;;  %v2031_v10 = vpack.c.bf16 %v5206_v30, %v5206_v30  ;;  %v4650_v30 = vld [vmem:[%s5759_s3 + $0x308] sm:$0xff]  }
 0x277   :  { %4361 = vmatpush3.bf16.msra.mxu1 %v4599_v42  ;;  %v5210_v48 = vpop.f32.mrb[47].mxu1  ;;  %v2122_v17 = vpack.c.bf16 %v5208_v47, %v5208_v47  ;;  %v4651_v47 = vld [vmem:[%s5759_s3 + $0x2d0] sm:$0xff]  }
 0x278   :  { %4329 = vmatpush3.bf16.msra.mxu0 %v4600_v43  ;;  %4362 = vmatprep.subr.bf16.mxu1 %v4601_v44  ;;  %v2121_v50 = vpack.c.bf16 %v5201_v45, %v5210_v48  ;;  %v4647_v43 = vld [vmem:[%s5759_s3 + $0x2c8] sm:$0xff]   ;;  %v4652_v48 = vld [vmem:[%s5759_s3 + $0x350] sm:$0xff]  }
 0x279   :  { %4346 = vmatprep.subr.bf16.mxu0 %v4602_v46 }
 0x27b   :  { %4331 = vmatmul.mubr.msk.bf16.vlgmr.msra.gmra.mrb[48].mxu0 %vm209_vm0, %v811_v51  ;;  %4363 = vmatpush3.bf16.msra.mxu1 %v4601_v44  ;;  %v4648_v44 = vld [vmem:[%s5759_s3 + $0x348] sm:$0xff]   ;;  %v4654_v51 = vld [vmem:[%s5759_s3 + $0x310] sm:$0xff]  }
 0x27c   :  { %4347 = vmatpush3.bf16.msra.mxu0 %v4602_v46  ;;  %4364 = vmatprep.subr.bf16.mxu1 %v4603_v49  ;;  %v4649_v46 = vld [vmem:[%s5759_s3 + $0x288] sm:$0xff]  }
 0x27d   :  { %4348 = vmatprep.subr.bf16.mxu0 %v4604_v52  ;;  %4354 = vmatprep.mubr.msk.bf16.mxu0 %vm209_vm0, %v1575_v4  ;;  %v4617_v4 = vld [vmem:[%s5759_s3 + $0x230] sm:$0xff]  }
 0x27f   :  { %4365 = vmatpush3.bf16.msra.mxu1 %v4603_v49 }
 0x280   :  { %4349 = vmatpush3.bf16.msra.mxu0 %v4604_v52  ;;  %4382 = vmatprep.subr.bf16.mxu1 %v4605_v53 }
 0x281   :  { %4350 = vmatprep.subr.bf16.mxu0 %v4606_v23 }
 0x282   :  { %4367 = vmatmul.mubr.msk.bf16.vlgmr.msra.gmra.mrb[64].mxu1 %vm209_vm0, %v1667_v54  ;;  %v4655_v54 = vld [vmem:[%s5759_s3 + $0x2d8] sm:$0xff]  }
 0x283   :  { %4383 = vmatpush3.bf16.msra.mxu1 %v4605_v53  ;;  %4390 = vmatprep.mubr.msk.bf16.mxu1 %vm209_vm0, %v1848_v33  ;;  %v4636_v33 = vld [vmem:[%s5759_s3 + $0x330] sm:$0xff]  }
 0x284   :  { %4351 = vmatpush3.bf16.msra.mxu0 %v4606_v23  ;;  %4384 = vmatprep.subr.bf16.mxu1 %v4607_v55 }
 0x285   :  { %4352 = vmatprep.subr.bf16.mxu0 %v4608_v56 }
 0x287   :  { %4385 = vmatpush3.bf16.msra.mxu1 %v4607_v55  ;;  %v4656_v55 = vld [vmem:[%s5759_s3 + $0x358] sm:$0xff]  }
 0x288   :  { %4353 = vmatpush3.bf16.msra.mxu0 %v4608_v56  ;;  %4386 = vmatprep.subr.bf16.mxu1 %v4609_v57  ;;  %v4657_v56 = vld [vmem:[%s5759_s3 + $0x298] sm:$0xff]  }
 0x289   :  { %4370 = vmatprep.subr.bf16.mxu0 %v4610_v58 }
 0x28b   :  { %4355 = vmatmul.mubr.msk.bf16.vlgmr.msra.gmra.mrb[52].mxu0 %vm209_vm0, %v1576_v60  ;;  %4387 = vmatpush3.bf16.msra.mxu1 %v4609_v57  ;;  %v4658_v57 = vld [vmem:[%s5759_s3 + $0x318] sm:$0xff]  }
 0x28c   :  { %4371 = vmatpush3.bf16.msra.mxu0 %v4610_v58  ;;  %4388 = vmatprep.subr.bf16.mxu1 %v4611_v59  ;;  %v4659_v58 = vld [vmem:[%s5759_s3 + $0x3a0] sm:$0xff]  }
 0x28d   :  { %4372 = vmatprep.subr.bf16.mxu0 %v4612_v61  ;;  %4378 = vmatprep.mubr.msk.bf16.mxu0 %vm209_vm0, %v1757_v19  ;;  %v4628_v19 = vld [vmem:[%s5759_s3 + $0x320] sm:$0xff]  }
 0x28f   :  { %4389 = vmatpush3.bf16.msra.mxu1 %v4611_v59  ;;  %v4660_v59 = vld [vmem:[%s5759_s3 + $0x420] sm:$0xff]  }
 0x290   :  { %4373 = vmatpush3.bf16.msra.mxu0 %v4612_v61  ;;  %4406 = vmatprep.subr.bf16.mxu1 %v4613_v62 }
 0x291   :  { %4374 = vmatprep.subr.bf16.mxu0 %v4614_v63 }
 0x292   :  { %4391 = vmatmul.mubr.msk.bf16.vlgmr.msra.gmra.mrb[68].mxu1 %vm209_vm0, %v1849_v1 }
 0x293   :  { %4407 = vmatpush3.bf16.msra.mxu1 %v4613_v62  ;;  %4414 = vmatprep.mubr.msk.bf16.mxu1 %vm209_vm0, %v2030_v25 }
 0x294   :  { %4375 = vmatpush3.bf16.msra.mxu0 %v4614_v63  ;;  %4408 = vmatprep.subr.bf16.mxu1 %v4615_v2 }
 0x295   :  { %4376 = vmatprep.subr.bf16.mxu0 %v4616_v3 }
 0x297   :  { %4409 = vmatpush3.bf16.msra.mxu1 %v4615_v2 }
 0x298   :  { %4377 = vmatpush3.bf16.msra.mxu0 %v4616_v3  ;;  %4410 = vmatprep.subr.bf16.mxu1 %v4617_v4 }
 0x299   :  { %4394 = vmatprep.subr.bf16.mxu0 %v4618_v5 }
 0x29b   :  { %4379 = vmatmul.mubr.msk.bf16.vlgmr.msra.gmra.mrb[56].mxu0 %vm209_vm0, %v1758_v7  ;;  %4411 = vmatpush3.bf16.msra.mxu1 %v4617_v4 }
 0x29c   :  { %4395 = vmatpush3.bf16.msra.mxu0 %v4618_v5  ;;  %4412 = vmatprep.subr.bf16.mxu1 %v4619_v6 }
 0x29d   :  { %4396 = vmatprep.subr.bf16.mxu0 %v4620_v8  ;;  %4402 = vmatprep.mubr.msk.bf16.mxu0 %vm209_vm0, %v1939_v21  ;;  %v4645_v21 = vld [vmem:[%s5759_s3 + $0x280] sm:$0xff]  }
 0x29f   :  { %4413 = vmatpush3.bf16.msra.mxu1 %v4619_v6 }
 0x2a0   :  { %4397 = vmatpush3.bf16.msra.mxu0 %v4620_v8  ;;  %4056 = vmatprep.subr.bf16.mxu1 %v4627_v18 }
 0x2a1   :  { %4398 = vmatprep.subr.bf16.mxu0 %v4621_v9 }
 0x2a2   :  { %4415 = vmatmul.mubr.msk.bf16.vlgmr.msra.gmra.mrb[72].mxu1 %vm209_vm0, %v2031_v10 }
 0x2a3   :  { %4057 = vmatpush3.bf16.msra.mxu1 %v4629_v20 }
 0x2a4   :  { %4399 = vmatpush3.bf16.msra.mxu0 %v4621_v9  ;;  %4058 = vmatprep.subr.bf16.mxu1 %v4631_v27 }
 0x2a5   :  { %4400 = vmatprep.subr.bf16.mxu0 %v4622_v11 }
 0x2a7   :  { %4059 = vmatpush3.bf16.msra.mxu1 %v4633_v29 }
 0x2a8   :  { %4401 = vmatpush3.bf16.msra.mxu0 %v4622_v11  ;;  %4060 = vmatprep.subr.bf16.mxu1 %v4635_v32 }
 0x2a9   :  { %4418 = vmatprep.subr.bf16.mxu0 %v4623_v12 }
 0x2ab   :  { %4403 = vmatmul.mubr.msk.bf16.vlgmr.msra.gmra.mrb[60].mxu0 %vm209_vm0, %v1940_v13  ;;  %4061 = vmatpush3.bf16.msra.mxu1 %v4637_v34 }
 0x2ac   :  { %4419 = vmatpush3.bf16.msra.mxu0 %v4623_v12  ;;  %4426 = vmatprep.mubr.msk.bf16.mxu0 %vm209_vm0, %v2121_v50  ;;  %v4653_v50 = vld [vmem:[%s5759_s3 + $0x290] sm:$0xff]  }
 0x2ad   :  { %4420 = vmatprep.subr.bf16.mxu0 %v4624_v14  ;;  %4062 = vmatprep.subr.bf16.mxu1 %v4639_v36 }
 0x2af   :  { %4063 = vmatpush3.bf16.msra.mxu1 %v4641_v37 }
 0x2b0   :  { %4421 = vmatpush3.bf16.msra.mxu0 %v4624_v14  ;;  %4064 = vmatprep.subr.bf16.mxu1 %v4643_v39 }
 0x2b1   :  { %4422 = vmatprep.subr.bf16.mxu0 %v4625_v16 }
 0x2b3   :  { %4065 = vmatpush3.bf16.msra.mxu1 %v4645_v21 }
 0x2b4   :  { %4423 = vmatpush3.bf16.msra.mxu0 %v4625_v16  ;;  %4066 = vmatprep.subr.bf16.mxu1 %v4647_v43 }
 0x2b5   :  { %4424 = vmatprep.subr.bf16.mxu0 %v4626_v15 }
 0x2b7   :  { %4067 = vmatpush3.bf16.msra.mxu1 %v4649_v46 }
 0x2b8   :  { %4425 = vmatpush3.bf16.msra.mxu0 %v4626_v15  ;;  %4068 = vmatprep.subr.bf16.mxu1 %v4651_v47 }
 0x2b9   :  { %4078 = vmatprep.subr.bf16.mxu0 %v4628_v19 }
 0x2bb   :  { %4427 = vmatmul.mubr.msk.bf16.vlgmr.msra.gmra.mrb[64].mxu0 %vm209_vm0, %v2122_v17  ;;  %4069 = vmatpush3.bf16.msra.mxu1 %v4653_v50 }
 0x2bc   :  { %4079 = vmatpush3.bf16.msra.mxu0 %v4630_v26  ;;  %4070 = vmatprep.subr.bf16.mxu1 %v4655_v54 }
 0x2bd   :  { %4080 = vmatprep.subr.bf16.mxu0 %v4632_v28 }
 0x2bf   :  { %4071 = vmatpush3.bf16.msra.mxu1 %v4657_v56 }
 0x2c0   :  { %4081 = vmatpush3.bf16.msra.mxu0 %v4634_v31  ;;  %4100 = vmatprep.subr.bf16.mxu1 %v4659_v58 }
 0x2c1   :  { %4082 = vmatprep.subr.bf16.mxu0 %v4636_v33 }
 0x2c4   :  { %4083 = vmatpush3.bf16.msra.mxu0 %v4638_v35 }
 0x2c5   :  { %4084 = vmatprep.subr.bf16.mxu0 %v4640_v22 }
 0x2c8   :  { %4085 = vmatpush3.bf16.msra.mxu0 %v4642_v38 }
 0x2c9   :  { %4086 = vmatprep.subr.bf16.mxu0 %v4644_v40 }
 0x2cc   :  { %4087 = vmatpush3.bf16.msra.mxu0 %v4646_v24 }
 0x2cd   :  { %4088 = vmatprep.subr.bf16.mxu0 %v4648_v44 }
 0x2d0   :  { %4089 = vmatpush3.bf16.msra.mxu0 %v4650_v30 }
 0x2d1   :  { %4090 = vmatprep.subr.bf16.mxu0 %v4652_v48 }
 0x2d4   :  { %4091 = vmatpush3.bf16.msra.mxu0 %v4654_v51 }
 0x2d5   :  { %4092 = vmatprep.subr.bf16.mxu0 %v4656_v55 }
 0x2d8   :  { %4093 = vmatpush3.bf16.msra.mxu0 %v4658_v57 }
 0x2d9   :  { %4122 = vmatprep.subr.bf16.mxu0 %v4660_v59 }
 0x30e   :  { %v4248_v25 = vpop.f32.mrb[32].mxu0 }
 0x30f   :  { %v886_v41 = vpop.f32.mrb[33].mxu0 }
 0x310   :  { %v4249_v42 = vpop.f32.mrb[34].mxu0 }
 0x311   :  { %v889_v45 = vpop.f32.mrb[35].mxu0 }
 0x315   :  { %v4272_v49 = vpop.f32.mrb[48].mxu1 }
 0x316   :  { %v1052_v52 = vpop.f32.mrb[49].mxu1 }
 0x317   :  { %v4273_v53 = vpop.f32.mrb[50].mxu1 }
 0x318   :  { %v1055_v23 = vpop.f32.mrb[51].mxu1 }
 0x31e   :  { %v4260_v60 = vpop.f32.mrb[36].mxu0 }
 0x31f   :  { %v973_v61 = vadd.f32 %v4260_v60, %v4248_v25  ;;  %v964_v62 = vpop.f32.mrb[37].mxu0 }
 0x320   :  { %v965_v63 = vadd.f32 %v964_v62, %v886_v41  ;;  %v4261_v1 = vpop.f32.mrb[38].mxu0 }
 0x321   :  { %v967_v2 = vpop.f32.mrb[39].mxu0 }
 0x322   :  { %v968_v3 = vadd.f32 %v967_v2, %v889_v45 }
 0x325   :  { %v4296_v4 = vpop.f32.mrb[52].mxu1 }
 0x326   :  { %v1218_v5 = vpop.f32.mrb[53].mxu1 }
 0x327   :  { %v4297_v6 = vpop.f32.mrb[54].mxu1 }
 0x328   :  { %v1221_v7 = vpop.f32.mrb[55].mxu1 }
 0x32e   :  { %v4284_v8 = vpop.f32.mrb[40].mxu0 }
 0x32f   :  { %v1139_v9 = vadd.f32 %v4284_v8, %v4272_v49  ;;  %v1130_v10 = vpop.f32.mrb[41].mxu0 }
 0x330   :  { %v1131_v11 = vadd.f32 %v1130_v10, %v1052_v52  ;;  %v4285_v12 = vpop.f32.mrb[42].mxu0 }
 0x331   :  { %v1133_v13 = vpop.f32.mrb[43].mxu0 }
 0x332   :  { %v1134_v14 = vadd.f32 %v1133_v13, %v1055_v23 }
 0x335   :  { %v4320_v16 = vpop.f32.mrb[56].mxu1 }
 0x336   :  { %v1384_v15 = vpop.f32.mrb[57].mxu1 }
 0x337   :  { %v4321_v17 = vpop.f32.mrb[58].mxu1 }
 0x338   :  { %v1387_v18 = vpop.f32.mrb[59].mxu1 }
 0x33e   :  { %v4308_v19 = vpop.f32.mrb[44].mxu0 }
 0x33f   :  { %v1305_v20 = vadd.f32 %v4308_v19, %v4296_v4  ;;  %v1296_v26 = vpop.f32.mrb[45].mxu0 }
 0x340   :  { %v1297_v27 = vadd.f32 %v1296_v26, %v1218_v5  ;;  %v4309_v28 = vpop.f32.mrb[46].mxu0 }
 0x341   :  { %v1299_v29 = vpop.f32.mrb[47].mxu0 }
 0x342   :  { %v1300_v31 = vadd.f32 %v1299_v29, %v1221_v7 }
 0x345   :  { %v4344_v32 = vpop.f32.mrb[60].mxu1 }
 0x346   :  { %v1566_v33 = vadd.f32 %v4344_v32, %v973_v61  ;;  %v1550_v34 = vpop.f32.mrb[61].mxu1 }
 0x347   :  { %v1564_v35 = vadd.f32 %v1550_v34, %v965_v63  ;;  %v4345_v36 = vpop.f32.mrb[62].mxu1 }
 0x348   :  { %v1553_v22 = vpop.f32.mrb[63].mxu1 }
 0x349   :  { %v1565_v37 = vadd.f32 %v1553_v22, %v968_v3 }
 0x34e   :  { %v4332_v38 = vpop.f32.mrb[48].mxu0 }
 0x34f   :  { %v1471_v39 = vadd.f32 %v4332_v38, %v4320_v16  ;;  %v1462_v40 = vpop.f32.mrb[49].mxu0 }
 0x350   :  { %v1463_v21 = vadd.f32 %v1462_v40, %v1384_v15  ;;  %v4333_v24 = vpop.f32.mrb[50].mxu0 }
 0x351   :  { %v1465_v25 = vpop.f32.mrb[51].mxu0 }
 0x352   :  { %v1466_v41 = vadd.f32 %v1465_v25, %v1387_v18 }
 0x355   :  { %v4368_v42 = vpop.f32.mrb[64].mxu1 }
 0x356   :  { %v1748_v43 = vadd.f32 %v4368_v42, %v1305_v20  ;;  %v1732_v44 = vpop.f32.mrb[65].mxu1 }
 0x357   :  { %v1746_v45 = vadd.f32 %v1732_v44, %v1297_v27  ;;  %v4369_v46 = vpop.f32.mrb[66].mxu1 }
 0x358   :  { %v1735_v30 = vpop.f32.mrb[67].mxu1 }
 0x359   :  { %v1747_v47 = vadd.f32 %v1735_v30, %v1300_v31 }
 0x35e   :  { %v4356_v48 = vpop.f32.mrb[52].mxu0 }
 0x35f   :  { %v1657_v49 = vadd.f32 %v4356_v48, %v1139_v9  ;;  %v1641_v50 = vpop.f32.mrb[53].mxu0  ;;  %v4662_v48 = vld [vmem:[%s5759_s3 + $0x3e0] sm:$0xff]  }
 0x360   :  { %v1655_v51 = vadd.f32 %v1641_v50, %v1131_v11  ;;  %v4357_v52 = vpop.f32.mrb[54].mxu0 }
 0x361   :  { %v1644_v53 = vpop.f32.mrb[55].mxu0 }
 0x362   :  { %v1656_v23 = vadd.f32 %v1644_v53, %v1134_v14 }
 0x365   :  { %v4392_v54 = vpop.f32.mrb[68].mxu1 }
 0x366   :  { %v1930_v55 = vadd.f32 %v4392_v54, %v1566_v33  ;;  %v1914_v56 = vpop.f32.mrb[69].mxu1  ;;  %v4663_v54 = vld [vmem:[%s5759_s3 + $0x3a8] sm:$0xff]  }
 0x367   :  { %v1928_v57 = vadd.f32 %v1914_v56, %v1564_v35  ;;  %v4393_v58 = vpop.f32.mrb[70].mxu1  ;;  %v2213_v35 = vld [vmem:[%s5762_s5 + $0x1] ss:$0 sm:$0xff]  ;;  %v4665_v56 = vld [vmem:[%s5759_s3 + $0x368] sm:$0xff]  }
 0x368   :  { %v1917_v59 = vpop.f32.mrb[71].mxu1  ;;  %v4667_v58 = vld [vmem:[%s5759_s3 + $0x3b0] sm:$0xff]  }
 0x369   :  { %v1929_v60 = vadd.f32 %v1917_v59, %v1565_v37  ;;  %v4668_v59 = vld [vmem:[%s5759_s3 + $0x430] sm:$0xff]  }
 0x36e   :  { %v4380_v61 = vpop.f32.mrb[56].mxu0 }
 0x36f   :  { %v1839_v62 = vadd.f32 %v4380_v61, %v1471_v39  ;;  %v1823_v63 = vpop.f32.mrb[57].mxu0  ;;  %v4670_v61 = vld [vmem:[%s5759_s3 + $0x3f0] sm:$0xff]  }
 0x370   :  { %v1837_v1 = vadd.f32 %v1823_v63, %v1463_v21  ;;  %v4381_v2 = vpop.f32.mrb[58].mxu0  ;;  %v4672_v63 = vld [vmem:[%s5759_s3 + $0x438] sm:$0xff]  }
 0x371   :  { %v1826_v3 = vpop.f32.mrb[59].mxu0  ;;  %v4674_v2 = vld [vmem:[%s5759_s3 + $0x3f8] sm:$0xff]  }
 0x372   :  { %v1838_v4 = vadd.f32 %v1826_v3, %v1466_v41  ;;  %v4675_v3 = vld [vmem:[%s5759_s3 + $0x3c0] sm:$0xff]  }
 0x375   :  { %v4416_v5 = vpop.f32.mrb[72].mxu1 }
 0x376   :  { %v2112_v6 = vadd.f32 %v4416_v5, %v1748_v43  ;;  %v2096_v7 = vpop.f32.mrb[73].mxu1  ;;  %v4677_v5 = vld [vmem:[%s5759_s3 + $0x380] sm:$0xff]  }
 0x377   :  { %v2110_v8 = vadd.f32 %v2096_v7, %v1746_v45  ;;  %v4417_v9 = vpop.f32.mrb[74].mxu1  ;;  %v4679_v7 = vld [vmem:[%s5759_s3 + $0x3c8] sm:$0xff]  }
 0x378   :  { %v2099_v10 = vpop.f32.mrb[75].mxu1  ;;  %v4681_v9 = vld [vmem:[%s5759_s3 + $0x388] sm:$0xff]  }
 0x379   :  { %v2111_v11 = vadd.f32 %v2099_v10, %v1747_v47  ;;  %v4661_v47 = vld [vmem:[%s5759_s3 + $0x360] sm:$0xff]   ;;  %v4682_v10 = vld [vmem:[%s5759_s3 + $0x408] sm:$0xff]  }
 0x37e   :  { %v4404_v12 = vpop.f32.mrb[60].mxu0 }
 0x37f   :  { %v2021_v13 = vadd.f32 %v4404_v12, %v1657_v49  ;;  %v2005_v14 = vpop.f32.mrb[61].mxu0  ;;  %v4684_v12 = vld [vmem:[%s5759_s3 + $0x450] sm:$0xff]  }
 0x380   :  { %v2019_v16 = vadd.f32 %v2005_v14, %v1655_v51  ;;  %v4405_v15 = vpop.f32.mrb[62].mxu0  ;;  %v4686_v14 = vld [vmem:[%s5759_s3 + $0x410] sm:$0xff]  }
 0x381   :  { %v2206_v17 = vadd.f32 %v2021_v13, %v1930_v55  ;;  %v2008_v18 = vpop.f32.mrb[63].mxu0  ;;  %v4664_v55 = vld [vmem:[%s5759_s3 + $0x428] sm:$0xff]   ;;  %v4685_v13 = vld [vmem:[%s5759_s3 + $0x390] sm:$0xff]   ;;  %v4688_v15 = vld [vmem:[%s5759_s3 + $0x458] sm:$0xff]  }
 0x382   :  { %v2204_v19 = vadd.f32 %v2019_v16, %v1928_v57  ;;  %v2020_v20 = vadd.f32 %v2008_v18, %v1656_v23  ;;  %v4666_v57 = vld [vmem:[%s5759_s3 + $0x3e8] sm:$0xff]   ;;  %v4687_v16 = vld [vmem:[%s5759_s3 + $0x3d8] sm:$0xff]  }
 0x383   :  { %v4690_v18 = vld [vmem:[%s5759_s3 + $0x418] sm:$0xff]  }
 0x384   :  { %v2205_v26 = vadd.f32 %v2020_v20, %v1929_v60  ;;  %v4669_v60 = vld [vmem:[%s5759_s3 + $0x370] sm:$0xff]   ;;  %v4691_v20 = vld [vmem:[%s5759_s3 + $0x460] sm:$0xff]  }
 0x38e   :  { %v4428_v27 = vpop.f32.mrb[64].mxu0 }
 0x38f   :  { %v2203_v28 = vadd.f32 %v4428_v27, %v1839_v62  ;;  %v2187_v29 = vpop.f32.mrb[65].mxu0  ;;  %v4671_v62 = vld [vmem:[%s5759_s3 + $0x3b8] sm:$0xff]  }
 0x390   :  { %v2201_v31 = vadd.f32 %v2187_v29, %v1837_v1  ;;  %v4429_v32 = vpop.f32.mrb[66].mxu0  ;;  %v4673_v1 = vld [vmem:[%s5759_s3 + $0x378] sm:$0xff]   ;;  %v4692_v29 = vld [vmem:[%s5759_s3 + $0x468] sm:$0xff]  }
 0x391   :  { %v2209_v33 = vadd.f32 %v2203_v28, %v2112_v6  ;;  %v2190_v34 = vpop.f32.mrb[67].mxu0  ;;  %v4678_v6 = vld [vmem:[%s5759_s3 + $0x400] sm:$0xff]   ;;  %v4744_v28 = vmov 0.0   ;;  %v4694_v32 = vld [vmem:[%s5759_s3 + $0x478] sm:$0xff]  }
 0x392   :  { %v2207_v36 = vadd.f32 %v2201_v31, %v2110_v8  ;;  %v2202_v22 = vadd.f32 %v2190_v34, %v1838_v4  ;;  %v4676_v4 = vld [vmem:[%s5759_s3 + $0x440] sm:$0xff]   ;;  %v4680_v8 = vld [vmem:[%s5759_s3 + $0x448] sm:$0xff]   ;;  %v4693_v31 = vld [vmem:[%s5759_s3 + $0x470] sm:$0xff]  }
 0x393   :  { %v2212_v37 = vadd.f32 %v2209_v33, %v2206_v17  ;;  %v4689_v17 = vld [vmem:[%s5759_s3 + $0x398] sm:$0xff]   ;;  %v4695_v33 = vld [vmem:[%s5759_s3 + $0x480] sm:$0xff]   ;;  %v4696_v34 = vld [vmem:[%s5759_s3 + $0x488] sm:$0xff]  }
 0x394   :  { %v2210_v38 = vadd.f32 %v2207_v36, %v2204_v19  ;;  %v2208_v39 = vadd.f32 %v2202_v22, %v2111_v11  ;;  %v4683_v11 = vld [vmem:[%s5759_s3 + $0x3d0] sm:$0xff]   ;;  %v4698_v36 = vld [vmem:[%s5759_s3 + $0x498] sm:$0xff]  }
 0x395   :  { %v5439_v40 = vadd.f32 %v2213_v35, %v2212_v37 }
 0x396   :  { %v2214_v21 = vadd.f32 %v2213_v35, %v2210_v38  ;;  %v2211_v24 = vadd.f32 %v2208_v39, %v2205_v26  ;;  %v4699_v38 = vld [vmem:[%s5759_s3 + $0x4a0] sm:$0xff]   ;;  %v4700_v39 = vld [vmem:[%s5759_s3 + $0x4a8] sm:$0xff]  }
 0x397   :  { %v2219_v22 = vmax.f32 %v5439_v40, 0.0  ;;  %v3128_v40 = vld [vmem:[%s5759_s3 + $0x4e0] sm:$0xf] }
 0x398   :  { %v2217_v25 = vmax.f32 %v2214_v21, 0.0  ;;  %v2215_v41 = vadd.f32 %v2213_v35, %v2211_v24  ;;  %v4697_v35 = vld [vmem:[%s5759_s3 + $0x490] sm:$0xff]   ;;  %v3137_v21 = vsel %vm3135_vm2, %v3128_v40, 0 }
 0x399   :  { %v2386_v37 = vpack.c.bf16 %v2219_v22, %v2219_v22  ;;  %v4701_v24 = vld [vmem:[%s5759_s3 + $0x4b0] sm:$0xff]  }
 0x39a   :  { %v5441_v42 = vmax.f32 %v2215_v41, 0.0  ;;  %v2221_v43 = vrot.slane %v2217_v25, 2  ;;  %v2225_v44 = vrot.slane %v2217_v25, 6  ;;  %v2223_v45 = vrot.slane %v2217_v25, 4  ;;  %v4703_v41 = vld [vmem:[%s5759_s3 + $0x4c0] sm:$0xff]  }
 0x39b   :  { %v2378_v51 = vpack.c.bf16 %v2217_v25, %v2217_v25  ;;  %v4702_v25 = vld [vmem:[%s5759_s3 + $0x4b8] sm:$0xff]  }
 0x39c   :  { %v2379_v46 = vpack.c.bf16 %v2221_v43, %v2221_v43  ;;  %v2381_v30 = vpack.c.bf16 %v2225_v44, %v2225_v44  ;;  %v2228_v49 = vrot.slane %v5441_v42, 2  ;;  %v2232_v50 = vrot.slane %v5441_v42, 6  ;;  %v4705_v43 = vld [vmem:[%s5759_s3 + $0x4d0] sm:$0xff]   ;;  %v3127_v44 = vld [vmem:[%s5763_s1] sm:$0x3] }
 0x39d   :  { %v2380_v52 = vpack.c.bf16 %v2223_v45, %v2223_v45  ;;  %v2230_v19 = vrot.slane %v5441_v42, 4  ;;  %v2382_v26 = vpack.c.bf16 %v5441_v42, %v5441_v42  ;;  %v4704_v42 = vld [vmem:[%s5759_s3 + $0x4c8] sm:$0xff]   ;;  %v3129_v45 = vpack.c.bf16 %v3127_v44, %v3127_v44  ;;  %v4726_v44 = vld [vmem:[%s5759_s3 + $0x4fc] sm:$0xff]  }
 0x39e   :  { %2852 = vmatprep.mubr.bf16.mxu1 %v2379_v46  ;;  %2892 = vmatprep.mubr.bf16.mxu0 %v2381_v30  ;;  %v2383_v53 = vpack.c.bf16 %v2228_v49, %v2228_v49  ;;  %v2385_v23 = vpack.c.bf16 %v2232_v50, %v2232_v50  ;;  %v4706_v46 = vld [vmem:[%s5759_s3 + $0x4d8] sm:$0xff]   ;;  %v4707_v30 = vld [vmem:[%s5764_s4 + $0x28] ss:$8 sps:$4 sm:$0xff]  }
 0x39f   :  { %2853 = vmatmul.mubr.bf16.vlgmr.msra.gmra.mrb[76].mxu1 %v2378_v51  ;;  %2893 = vmatmul.mubr.bf16.vlgmr.msra.gmra.mrb[68].mxu0 %v2380_v52  ;;  %v2384_v27 = vpack.c.bf16 %v2230_v19, %v2230_v19  ;;  %v4715_v49 = vld [vmem:[%s5764_s4 + $0x3c] ss:$8 sps:$4 sm:$0xff]   ;;  %v4713_v50 = vld [vmem:[%s5764_s4 + $0x38] ss:$8 sps:$4 sm:$0xff]  }
 0x3a0   :  { %4101 = vmatpush3.bf16.msra.mxu1 %v4661_v47  ;;  %4123 = vmatpush3.bf16.msra.mxu0 %v4662_v48  ;;  %v4709_v47 = vld [vmem:[%s5764_s4 + $0x2c] ss:$8 sps:$4 sm:$0xff]  }
 0x3a1   :  { %2932 = vmatprep.mubr.bf16.mxu1 %v2383_v53  ;;  %2972 = vmatprep.mubr.bf16.mxu0 %v2385_v23  ;;  %v4712_v48 = vld [vmem:[%s5764_s4 + $0x4] ss:$8 sps:$4 sm:$0xff]   ;;  %v2387_v53 = vld [vmem:[%s5762_s5 + $0x2] ss:$0 sm:$0xff] }
 0x3a2   :  { %4102 = vmatprep.subr.bf16.mxu1 %v4663_v54  ;;  %4124 = vmatprep.subr.bf16.mxu0 %v4664_v55 }
 0x3a4   :  { %4103 = vmatpush3.bf16.msra.mxu1 %v4665_v56  ;;  %4125 = vmatpush3.bf16.msra.mxu0 %v4666_v57 }
 0x3a5   :  { %4104 = vmatprep.subr.bf16.mxu1 %v4667_v58  ;;  %4126 = vmatprep.subr.bf16.mxu0 %v4668_v59 }
 0x3a8   :  { %4105 = vmatpush3.bf16.msra.mxu1 %v4669_v60  ;;  %4127 = vmatpush3.bf16.msra.mxu0 %v4670_v61 }
 0x3a9   :  { %4106 = vmatprep.subr.bf16.mxu1 %v4671_v62  ;;  %4128 = vmatprep.subr.bf16.mxu0 %v4672_v63  ;;  %v3190_v63 = vld [vmem:[%s5764_s4 + $0x48] sm:$0xff] }
 0x3ac   :  { %4107 = vmatpush3.bf16.msra.mxu1 %v4673_v1  ;;  %4129 = vmatpush3.bf16.msra.mxu0 %v4674_v2  ;;  %v3895_v1 = vcombine.high %v3190_v63, %v3190_v63  ;;  %v3894_v2 = vcombine.low %v3190_v63, %v3190_v63 }
 0x3ad   :  { %4108 = vmatprep.subr.bf16.mxu1 %v4675_v3  ;;  %4130 = vmatprep.subr.bf16.mxu0 %v4676_v4 }
 0x3ae   :  { %v3222_v3 = vsel %vm3135_vm2, %v3894_v2, 0  ;;  %v3906_v2 = vld [vmem:[%s5762_s5 + $0x5] ss:$8 sm:$0x3] }
 0x3b0   :  { %4109 = vmatpush3.bf16.msra.mxu1 %v4677_v5  ;;  %4131 = vmatpush3.bf16.msra.mxu0 %v4678_v6 }
 0x3b1   :  { %4110 = vmatprep.subr.bf16.mxu1 %v4679_v7  ;;  %4132 = vmatprep.subr.bf16.mxu0 %v4680_v8 }
 0x3b4   :  { %4111 = vmatpush3.bf16.msra.mxu1 %v4681_v9  ;;  %4133 = vmatpush3.bf16.msra.mxu0 %v4682_v10 }
 0x3b5   :  { %4112 = vmatprep.subr.bf16.mxu1 %v4683_v11  ;;  %4134 = vmatprep.subr.bf16.mxu0 %v4684_v12 }
 0x3b8   :  { %4113 = vmatpush3.bf16.msra.mxu1 %v4685_v13  ;;  %4135 = vmatpush3.bf16.msra.mxu0 %v4686_v14 }
 0x3b9   :  { %4114 = vmatprep.subr.bf16.mxu1 %v4687_v16  ;;  %4136 = vmatprep.subr.bf16.mxu0 %v4688_v15 }
 0x3bc   :  { %4115 = vmatpush3.bf16.msra.mxu1 %v4689_v17  ;;  %4137 = vmatpush3.bf16.msra.mxu0 %v4690_v18 }
 0x3bd   :  { %4430 = vmatprep.subr.bf16.mxu1 %v4744_v28  ;;  %4450 = vmatprep.subr.bf16.mxu0 %v4744_v28 }
 0x3bf   :  { %2933 = vmatmul.mubr.bf16.vlgmr.msra.gmra.mrb[80].mxu1 %v2382_v26  ;;  %2973 = vmatmul.mubr.bf16.vlgmr.msra.gmra.mrb[72].mxu0 %v2384_v27  ;;  %v4710_v27 = vld [vmem:[%s5764_s4] ss:$8 sps:$4 sm:$0xff]  }
 0x3c0   :  { %4431 = vmatpush3.bf16.msra.mxu1 %v4691_v20  ;;  %4446 = vmatprep.mubr.msk.bf16.mxu1 %vm4745_vm1, %v4744_v28 }
 0x3c1   :  { %4432 = vmatprep.subr.bf16.mxu1 %v4744_v28  ;;  %4466 = vmatprep.mubr.msk.bf16.mxu0 %vm4745_vm1, %v4744_v28 }
 0x3c2   :  { %4451 = vmatpush3.bf16.msra.mxu0 %v4699_v38 }
 0x3c3   :  { %4452 = vmatprep.subr.bf16.mxu0 %v4744_v28 }
 0x3c4   :  { %4433 = vmatpush3.bf16.msra.mxu1 %v4692_v29 }
 0x3c5   :  { %4434 = vmatprep.subr.bf16.mxu1 %v4744_v28 }
 0x3c6   :  { %4453 = vmatpush3.bf16.msra.mxu0 %v4700_v39  ;;  %v3184_v39 = vld [vmem:[%s5764_s4 + $0x20] sm:$0xff] }
 0x3c7   :  { %4454 = vmatprep.subr.bf16.mxu0 %v4744_v28  ;;  %v3903_v40 = vcombine.high %v3184_v39, %v3184_v39 }
 0x3c8   :  { %4435 = vmatpush3.bf16.msra.mxu1 %v4693_v31  ;;  %v4718_v31 = vld [vmem:[%s5764_s4 + $0x14] ss:$8 sps:$4 sm:$0xff]  }
 0x3c9   :  { %4436 = vmatprep.subr.bf16.mxu1 %v4744_v28 }
 0x3ca   :  { %4455 = vmatpush3.bf16.msra.mxu0 %v4701_v24 }
 0x3cb   :  { %4456 = vmatprep.subr.bf16.mxu0 %v4744_v28 }
 0x3cc   :  { %4437 = vmatpush3.bf16.msra.mxu1 %v4694_v32  ;;  %v4716_v32 = vld [vmem:[%s5764_s4 + $0x10] ss:$8 sps:$4 sm:$0xff]  }
 0x3cd   :  { %4438 = vmatprep.subr.bf16.mxu1 %v4744_v28 }
 0x3ce   :  { %4457 = vmatpush3.bf16.msra.mxu0 %v4702_v25 }
 0x3cf   :  { %4458 = vmatprep.subr.bf16.mxu0 %v4744_v28 }
 0x3d0   :  { %4439 = vmatpush3.bf16.msra.mxu1 %v4695_v33  ;;  %v3130_v33 = vld [vmem:[%s5762_s5 + $0x4] ss:$0 sm:$0xff] }
 0x3d1   :  { %4440 = vmatprep.subr.bf16.mxu1 %v4744_v28 }
 0x3d2   :  { %4459 = vmatpush3.bf16.msra.mxu0 %v4703_v41  ;;  %v4723_v41 = vld [vmem:[%s5759_s3 + $0x4e4] sm:$0xff]  }
 0x3d3   :  { %4460 = vmatprep.subr.bf16.mxu0 %v4744_v28 }
 0x3d4   :  { %4441 = vmatpush3.bf16.msra.mxu1 %v4696_v34 }
 0x3d5   :  { %4442 = vmatprep.subr.bf16.mxu1 %v4744_v28 }
 0x3d6   :  { %4461 = vmatpush3.bf16.msra.mxu0 %v4704_v42  ;;  %v4724_v42 = vld [vmem:[%s5759_s3 + $0x4ec] sm:$0xff]  }
 0x3d7   :  { %4462 = vmatprep.subr.bf16.mxu0 %v4744_v28 }
 0x3d8   :  { %4443 = vmatpush3.bf16.msra.mxu1 %v4697_v35 }
 0x3d9   :  { %4444 = vmatprep.subr.bf16.mxu1 %v4744_v28 }
 0x3da   :  { %4463 = vmatpush3.bf16.msra.mxu0 %v4705_v43  ;;  %v4725_v43 = vld [vmem:[%s5759_s3 + $0x4f4] sm:$0xff]  }
 0x3db   :  { %4464 = vmatprep.subr.bf16.mxu0 %v4744_v28 }
 0x3dc   :  { %4445 = vmatpush3.bf16.msra.mxu1 %v4698_v36 }
 0x3dd   :  { %4470 = vmatprep.subr.bf16.mxu1 %v4744_v28 }
 0x3de   :  { %4465 = vmatpush3.bf16.msra.mxu0 %v4706_v46  ;;  %v4728_v46 = vld [vmem:[%s5759_s3 + $0x50c] sm:$0xff]  }
 0x3df   :  { %4447 = vmatmul.mubr.bf16.vlgmr.msra.gmra.mrb[84].mxu1 %v2386_v37  ;;  %3302 = vmatprep.subr.bf16.mxu0 %v4712_v48 }
 0x3e0   :  { %4472 = vmatprep.mubr.msk.bf16.mxu1 %vm4745_vm1, %v4744_v28  ;;  %4471 = vmatpush3.bf16.msra.mxu1 %v3137_v21  ;;  %v3902_v21 = vcombine.low %v3184_v39, %v3184_v39 }
 0x3e1   :  { %3227 = vmatprep.subr.bf16.mxu1 %v4709_v47  ;;  %v3038_v47 = vld [vmem:[%s5762_s5 + $0x3] ss:$0 sm:$0xff] }
 0x3e2   :  { %v3297_v25 = vsel %vm3135_vm2, %v3902_v21, 0 }
 0x3e7   :  { %4473 = vmatmul.mubr.msk.bf16.vlgmr.msra.gmra.mrb[88].mxu1 %vm3131_vm3, %v3129_v45  ;;  %v4727_v45 = vld [vmem:[%s5759_s3 + $0x504] sm:$0xff]  }
 0x3e8   :  { %3259 = vmatprep.mubr.bf16.mxu1 %v4743_v0  ;;  %3228 = vmatpush1.bf16.msra.mxu1 %v4707_v30  ;;  %v4729_v30 = vld [vmem:[%s5759_s3 + $0x514] sm:$0xff]  }
 0x3e9   :  { %3229 = vmatprep.subr.bf16.mxu1 %v4715_v49 }
 0x3ec   :  { %3230 = vmatpush1.bf16.msra.mxu1 %v4713_v50 }
 0x3ed   :  { %3896 = vmatprep.subr.msk.bf16.mxu1 %vm3135_vm2, %v3895_v1 }
 0x3f0   :  { %3232 = vmatpush1.bf16.msra.mxu1 %v3222_v3 }
 0x3f1   :  { %3447 = vmatprep.subr.bf16.mxu1 %v4743_v0 }
 0x472   :  { %v4072_v51 = vpop.f32.mrb[76].mxu1  ;;  %v4094_v52 = vpop.f32.mrb[68].mxu0 }
 0x473   :  { %v4073_v23 = vpop.f32.mrb[77].mxu1  ;;  %v4095_v54 = vpop.f32.mrb[69].mxu0 }
 0x474   :  { %v4074_v55 = vadd.f32 %v4073_v23, %v4072_v51  ;;  %v4096_v56 = vadd.f32 %v4095_v54, %v4094_v52  ;;  %v4075_v57 = vpop.f32.mrb[78].mxu1  ;;  %v4097_v58 = vpop.f32.mrb[70].mxu0 }
 0x475   :  { %v4076_v59 = vpop.f32.mrb[79].mxu1  ;;  %v4098_v60 = vpop.f32.mrb[71].mxu0  ;;  %v4731_v58 = vld [vmem:[%s5759_s3 + $0x524] sm:$0xff]  }
 0x476   :  { %v2855_v61 = vadd.f32 %v4074_v55, %v2387_v53  ;;  %v4730_v55 = vld [vmem:[%s5759_s3 + $0x51c] sm:$0xff]   ;;  %v4732_v59 = vld [vmem:[%s5759_s3 + $0x52c] sm:$0xff]   ;;  %v4733_v60 = vld [vmem:[%s5759_s3 + $0x534] sm:$0xff]  }
 0x478   :  { %v2895_v62 = vadd.f32 %v4096_v56, %v2855_v61  ;;  %v4734_v61 = vld [vmem:[%s5759_s3 + $0x53c] sm:$0xff]  }
 0x492   :  { %v4116_v4 = vpop.f32.mrb[80].mxu1  ;;  %v4138_v5 = vpop.f32.mrb[72].mxu0 }
 0x493   :  { %v4117_v6 = vpop.f32.mrb[81].mxu1  ;;  %v4139_v7 = vpop.f32.mrb[73].mxu0 }
 0x494   :  { %v4118_v8 = vadd.f32 %v4117_v6, %v4116_v4  ;;  %v4140_v9 = vadd.f32 %v4139_v7, %v4138_v5  ;;  %v4119_v10 = vpop.f32.mrb[82].mxu1  ;;  %v4141_v11 = vpop.f32.mrb[74].mxu0 }
 0x495   :  { %v4120_v12 = vpop.f32.mrb[83].mxu1  ;;  %v4142_v13 = vpop.f32.mrb[75].mxu0 }
 0x496   :  { %v2935_v14 = vadd.f32 %v4118_v8, %v2895_v62  ;;  %v3346_v62 = vlaneseq }
 0x498   :  { %v2975_v16 = vadd.f32 %v4140_v9, %v2935_v14  ;;  %v3347_v63 = vshrl.u32 %v3346_v62, 7 }
 0x49a   :  { %v3348_v1 = vsub.s32 0, %v3347_v63  ;;  %v3352_v3 = vsub.s32 1, %v3347_v63 }
 0x49c   :  { %v3349_v4 = vrot.slane %v3906_v2, %v3348_v1  ;;  %v3353_v6 = vrot.slane %v3906_v2, %v3352_v3 }
 0x4b2   :  { %v3014_v15 = vpop.f32.mrb[84].mxu1 }
 0x4b3   :  { %v3015_v17 = vadd.f32 %v3014_v15, %v2975_v16  ;;  %v4448_v18 = vpop.f32.mrb[85].mxu1 }
 0x4b4   :  { %v3017_v19 = vpop.f32.mrb[86].mxu1  ;;  %v4736_v18 = vld [vmem:[%s5759_s3 + $0x54c] sm:$0xff]  }
 0x4b5   :  { %v3020_v20 = vmax.f32 %v3015_v17, 0.0  ;;  %v4449_v26 = vpop.f32.mrb[87].mxu1  ;;  %v4737_v19 = vld [vmem:[%s5759_s3 + $0x554] sm:$0xff]  }
 0x4b7   :  { %v3037_v29 = vpack.c.bf16 %v3020_v20, %v3020_v20  ;;  %v3382_v20 = vld [vmem:[%s5762_s5 + $0x6] ss:$0 sm:$0xff] }
 0x4b9   :  { %4467 = vmatmul.mubr.bf16.vlgmr.msra.gmra.mrb[76].mxu0 %v3037_v29 }
 0x4ba   :  { %3303 = vmatpush1.bf16.msra.mxu0 %v4710_v27  ;;  %3334 = vmatprep.mubr.bf16.mxu0 %v4743_v0  ;;  %v3173_v34 = vpop.f32.mrb[88].mxu1 }
 0x4bb   :  { %3304 = vmatprep.subr.bf16.mxu0 %v4718_v31  ;;  %v3174_v35 = vadd.f32 %v3173_v34, %v3130_v33  ;;  %v4474_v36 = vpop.f32.mrb[89].mxu1  ;;  %v4738_v34 = vld [vmem:[%s5759_s3 + $0x55c] sm:$0xff]  }
 0x4bc   :  { %v3176_v22 = vpop.f32.mrb[90].mxu1  ;;  %v4739_v36 = vld [vmem:[%s5759_s3 + $0x564] sm:$0xff]  }
 0x4bd   :  { %v3179_v37 = vmax.f32 %v3174_v35, 0.0  ;;  %v4475_v38 = vpop.f32.mrb[91].mxu1  ;;  %v4740_v22 = vld [vmem:[%s5759_s3 + $0x56c] ss:$0 sps:$4 sm:$0xff]  }
 0x4be   :  { %3305 = vmatpush1.bf16.msra.mxu0 %v4716_v32  ;;  %v3499_v38 = vld [vmem:[%s5762_s5 + $0x7] ss:$0 sm:$0xff] }
 0x4bf   :  { %v3191_v24 = vpack.c.bf16 %v3179_v37, %v3179_v37  ;;  %3904 = vmatprep.subr.msk.bf16.mxu0 %vm3135_vm2, %v3903_v40  ;;  %v3601_v37 = vsel %vm3135_vm2, %v4740_v22, 0 }
 0x4c1   :  { %3897 = vmatmul.mubr.msk.bf16.vlgmr.msra.gmra.mrb[92].mxu1 %vm3217_vm4, %v3191_v24 }
 0x4c2   :  { %3307 = vmatpush1.bf16.msra.mxu0 %v3297_v25  ;;  %3448 = vmatpush1.bf16.msra.mxu1 %v4723_v41 }
 0x4c3   :  { %4476 = vmatprep.subr.bf16.mxu0 %v4744_v28  ;;  %3449 = vmatprep.subr.bf16.mxu1 %v4743_v0 }
 0x4c6   :  { %3450 = vmatpush1.bf16.msra.mxu1 %v4724_v42 }
 0x4c7   :  { %3451 = vmatprep.subr.bf16.mxu1 %v4743_v0 }
 0x4ca   :  { %3452 = vmatpush1.bf16.msra.mxu1 %v4725_v43 }
 0x4cb   :  { %3453 = vmatprep.subr.bf16.mxu1 %v4743_v0 }
 0x4ce   :  { %3454 = vmatpush1.bf16.msra.mxu1 %v4726_v44 }
 0x4cf   :  { %3455 = vmatprep.subr.bf16.mxu1 %v4743_v0 }
 0x4d2   :  { %3456 = vmatpush1.bf16.msra.mxu1 %v4727_v45 }
 0x4d3   :  { %3457 = vmatprep.subr.bf16.mxu1 %v4743_v0 }
 0x4d6   :  { %3458 = vmatpush1.bf16.msra.mxu1 %v4728_v46 }
 0x4d7   :  { %3459 = vmatprep.subr.bf16.mxu1 %v4743_v0 }
 0x4da   :  { %3460 = vmatpush1.bf16.msra.mxu1 %v4729_v30 }
 0x4db   :  { %3461 = vmatprep.subr.bf16.mxu1 %v4743_v0 }
 0x4de   :  { %3462 = vmatpush1.bf16.msra.mxu1 %v4730_v55 }
 0x4df   :  { %3463 = vmatprep.subr.bf16.mxu1 %v4743_v0 }
 0x4e2   :  { %3464 = vmatpush1.bf16.msra.mxu1 %v4731_v58 }
 0x4e3   :  { %3465 = vmatprep.subr.bf16.mxu1 %v4743_v0  ;;  %v4735_v0 = vld [vmem:[%s5759_s3 + $0x544] sm:$0xff]  }
 0x4e6   :  { %3466 = vmatpush1.bf16.msra.mxu1 %v4732_v59 }
 0x58c   :  { %v3121_v48 = vpop.f32.mrb[76].mxu0 }
 0x58d   :  { %v3122_v49 = vadd.f32 %v3121_v48, %v3038_v47  ;;  %v4468_v50 = vpop.f32.mrb[77].mxu0  ;;  %v3644_v47 = vand.u32 127, %v3346_v62 }
 0x58e   :  { %v3124_v51 = vpop.f32.mrb[78].mxu0 }
 0x58f   :  { %v3185_v52 = vpack.c.bf16 %v3122_v49, %v3122_v49  ;;  %v4469_v53 = vpop.f32.mrb[79].mxu0  ;;  %vm3645_vm7 = vcmp.lt.s32.totalorder %v3644_v47, 4 }
 0x591   :  { %3905 = vmatmul.mubr.msk.bf16.vlgmr.msra.gmra.mrb[80].mxu0 %vm3217_vm4, %v3185_v52 }
 0x592   :  { %4486 = vmatprep.mubr.msk.bf16.mxu0 %vm4745_vm1, %v4744_v28  ;;  %4477 = vmatpush3.bf16.msra.mxu0 %v4733_v60 }
 0x593   :  { %4478 = vmatprep.subr.bf16.mxu0 %v4744_v28 }
 0x594   :  { %v3261_v23 = vpop.f32.mrb[92].mxu1 }
 0x595   :  { %v3263_v54 = vpop.f32.mrb[93].mxu1 }
 0x596   :  { %v3265_v56 = vpop.f32.mrb[94].mxu1  ;;  %4479 = vmatpush3.bf16.msra.mxu0 %v4734_v61 }
 0x597   :  { %v3266_v57 = vpop.f32.mrb[95].mxu1  ;;  %4480 = vmatprep.subr.bf16.mxu0 %v4744_v28 }
 0x59a   :  { %4481 = vmatpush3.bf16.msra.mxu0 %v4735_v0 }
 0x59b   :  { %4482 = vmatprep.subr.bf16.mxu0 %v4744_v28 }
 0x59e   :  { %4483 = vmatpush3.bf16.msra.mxu0 %v4736_v18 }
 0x59f   :  { %4484 = vmatprep.subr.bf16.mxu0 %v4744_v28 }
 0x5a2   :  { %4485 = vmatpush3.bf16.msra.mxu0 %v4737_v19 }
 0x5a3   :  { %4490 = vmatprep.subr.bf16.mxu0 %v4744_v28 }
 0x664   :  { %v3336_v5 = vpop.f32.mrb[80].mxu0 }
 0x665   :  { %v3337_v7 = vadd.f32 %v3336_v5, %v3261_v23  ;;  %v3338_v8 = vpop.f32.mrb[81].mxu0 }
 0x666   :  { %v3339_v9 = vadd.f32 %v3338_v8, %v3263_v54  ;;  %v3340_v10 = vpop.f32.mrb[82].mxu0 }
 0x667   :  { %v3356_v11 = vadd.f32 %v3349_v4, %v3337_v7  ;;  %v3341_v12 = vpop.f32.mrb[83].mxu0 }
 0x668   :  { %v3357_v13 = vadd.f32 %v3353_v6, %v3339_v9 }
 0x669   :  { %v3358_v14 = vmax.f32 %v3356_v11, 0.0 }
 0x66a   :  { %v3359_v16 = vmax.f32 %v3357_v13, 0.0 }
 0x66b   :  { %v3380_v17 = vpack.c.bf16 %v3358_v14, %v3358_v14 }
 0x66c   :  { %v3381_v15 = vpack.c.bf16 %v3359_v16, %v3359_v16 }
 0x66e   :  { %3917 = vmatprep.mubr.msk.bf16.mxu1 %vm3443_vm5, %v3381_v15 }
 0x66f   :  { %3480 = vmatmul.mubr.bf16.vlgmr.msra.gmra.mrb[96].mxu1 %v3380_v17 }
 0x742   :  { %v3481_v26 = vpop.f32.mrb[96].mxu1 }
 0x743   :  { %v3482_v27 = vadd.f32 %v3481_v26, %v3382_v20  ;;  %v3483_v29 = vpop.f32.mrb[97].mxu1 }
 0x744   :  { %v3484_v31 = vpop.f32.mrb[98].mxu1 }
 0x745   :  { %v3487_v32 = vmax.f32 %v3482_v27, 0.0  ;;  %v3485_v33 = vpop.f32.mrb[99].mxu1 }
 0x747   :  { %v3498_v35 = vpack.c.bf16 %v3487_v32, %v3487_v32 }
 0x749   :  { %4487 = vmatmul.mubr.msk.bf16.vlgmr.msra.gmra.mrb[84].mxu0 %vm3530_vm6, %v3498_v35 }
 0x74a   :  { %4491 = vmatpush3.bf16.msra.mxu0 %v4738_v34  ;;  %4496 = vmatprep.mubr.msk.bf16.mxu0 %vm4745_vm1, %v4744_v28 }
 0x74b   :  { %4492 = vmatprep.subr.bf16.mxu0 %v4744_v28 }
 0x74e   :  { %4493 = vmatpush3.bf16.msra.mxu0 %v4739_v36 }
 0x74f   :  { %4494 = vmatprep.subr.bf16.mxu0 %v4744_v28  ;;  %v3581_v28 = vld [vmem:[%s5762_s5 + $0x10] ss:$0 sm:$0xff] }
 0x752   :  { %4495 = vmatpush3.bf16.msra.mxu0 %v3601_v37 }
 0x81c   :  { %v3568_v39 = vpop.f32.mrb[84].mxu0 }
 0x81d   :  { %v3569_v40 = vadd.f32 %v3568_v39, %v3499_v38  ;;  %v4488_v21 = vpop.f32.mrb[85].mxu0 }
 0x81e   :  { %v3571_v24 = vpop.f32.mrb[86].mxu0 }
 0x81f   :  { %v3574_v25 = vmax.f32 %v3569_v40, 0.0  ;;  %v4489_v41 = vpop.f32.mrb[87].mxu0 }
 0x821   :  { %v3580_v42 = vpack.c.bf16 %v3574_v25, %v3574_v25 }
 0x823   :  { %4497 = vmatmul.mubr.msk.bf16.vlgmr.msra.gmra.mrb[88].mxu0 %vm3217_vm4, %v3580_v42 }
 0x8f6   :  { %v3637_v43 = vpop.f32.mrb[88].mxu0 }
 0x8f7   :  { %v3638_v44 = vadd.f32 %v3637_v43, %v3581_v28  ;;  %v4498_v45 = vpop.f32.mrb[89].mxu0 }
 0x8f8   :  { %v3640_v46 = vpop.f32.mrb[90].mxu0 }
 0x8f9   :  { %4741 = vtanh.f32 %v3638_v44  ;;  %v4499_v30 = vpop.f32.mrb[91].mxu0 }
 0x903   :  { %v4742_v48 = vpop.eup %4741 }
 0x904   :  { %v3647_v49 = vsel %vm3645_vm7, %v4742_v48, %v3638_v44 }
 0x905   :  { %3648 = vst [vmem:[%s5765_s6] sm:$0x3] %v3647_v49 }

</bundles_post_ra>
